<compile_context>
chip_gen: v6e
topology: v6e:2x2x1
jax: 0.10.0
libtpu: 0.0.40
codegen_flags: <defaults>
</compile_context>

<pallas_src>
import functools
import math

import jax
import jax.numpy as jnp
import numpy as np
from jax.experimental import pallas as pl
from jax.experimental.pallas import tpu as pltpu


# ----------------------------------------------------------------------------
# Fused encoder kernel: one grid step == one encoder layer.
# ----------------------------------------------------------------------------
def _encoder_kernel(
    x_ref, wqkv_ref, bqkv_ref, wo_ref, bo_ref, w1_ref, b1_ref, w2_ref, b2_ref,
    g1_ref, be1_ref, g2_ref, be2_ref, gf_ref, bf_ref,
    out_ref, attn_ref,
    xs_ref, qkv_ref, ctx_ref,
    *, B, L, H, dh, eps,
):
    layer = pl.program_id(0)
    last = pl.num_programs(0) - 1
    D = H * dh
    scale = 1.0 / math.sqrt(dh)

    # Load the input activations into the resident VMEM residual stream once.
    @pl.when(layer == 0)
    def _():
        xs_ref[...] = x_ref[...].astype(jnp.float32)

    x2d = xs_ref[...]                                        # (B*L, D) f32

    # ---- fused QKV projection: one (D, 3D) MXU matmul ----
    qkv_ref[...] = (
        jnp.dot(x2d, wqkv_ref[0], preferred_element_type=jnp.float32)
        + bqkv_ref[0]
    )

    # ---- multi-head full attention, everything stays in VMEM ----
    for b in range(B):
        r0 = b * L
        for h in range(H):
            c0 = h * dh
            q_bh = qkv_ref[r0:r0 + L, c0:c0 + dh]                       # (L, dh)
            k_bh = qkv_ref[r0:r0 + L, D + c0:D + c0 + dh]               # (L, dh)
            v_bh = qkv_ref[r0:r0 + L, 2 * D + c0:2 * D + c0 + dh]       # (L, dh)
            # q @ k^T without materializing a transpose of K.
            s = jax.lax.dot_general(
                q_bh, k_bh,
                dimension_numbers=(((1,), (1,)), ((), ())),
                preferred_element_type=jnp.float32,
            ) * scale
            m = jnp.max(s, axis=-1, keepdims=True)
            p = jnp.exp(s - m)
            p = p * pl.reciprocal(jnp.sum(p, axis=-1, keepdims=True), approx=True)
            attn_ref[0, b * H + h] = p.astype(attn_ref.dtype)
            ctx_ref[r0:r0 + L, c0:c0 + dh] = jnp.dot(
                p, v_bh, preferred_element_type=jnp.float32)

    def layer_norm(y, g, beta):
        mean = jnp.mean(y, axis=-1, keepdims=True)
        var = jnp.mean(jnp.square(y - mean), axis=-1, keepdims=True)
        return (y - mean) * jax.lax.rsqrt(var + eps) * g + beta

    # ---- output projection + residual + LayerNorm 1 (fused epilogue) ----
    new_x = (jnp.dot(ctx_ref[...], wo_ref[0], preferred_element_type=jnp.float32)
             + bo_ref[0])
    x1 = layer_norm(x2d + new_x, g1_ref[0], be1_ref[0])      # dropout == identity

    # ---- FFN (kernel_size=1 convs == dense); d_ff intermediate stays in VMEM ----
    h1 = jnp.maximum(
        jnp.dot(x1, w1_ref[0], preferred_element_type=jnp.float32) + b1_ref[0],
        0.0)
    y2 = jnp.dot(h1, w2_ref[0], preferred_element_type=jnp.float32) + b2_ref[0]
    x_new = layer_norm(x1 + y2, g2_ref[0], be2_ref[0])

    xs_ref[...] = x_new                                      # carry to next layer

    # ---- final norm_layer, written once after the last encoder layer ----
    @pl.when(layer == last)
    def _():
        out_ref[...] = layer_norm(x_new, gf_ref[...], bf_ref[...]).astype(out_ref.dtype)


# ----------------------------------------------------------------------------
# Wrapper
# ----------------------------------------------------------------------------
def encoder_forward(x, params, n_heads):
    # TODO(synk): attn_mask / tau / delta (masked or de-stationary attention)
    # and the conv_layers distillation branch are not instantiated here
    # (this corresponds to conv_layers=None, FullAttention(mask_flag=False)).
    B, L, D = x.shape
    H = n_heads
    dh = D // H
    NL = params["Wqkv"].shape[0]
    d_ff = params["W1"].shape[-1]
    BL = B * L

    x2d = x.reshape(BL, D)

    kernel = functools.partial(_encoder_kernel, B=B, L=L, H=H, dh=dh, eps=1e-5)

    def per_layer(shape_2d):
        return pl.BlockSpec((1,) + shape_2d, lambda l: (l, 0, 0))

    def fixed(shape_2d):
        return pl.BlockSpec(shape_2d, lambda l: (0, 0))

    out2d, attn_st = pl.pallas_call(
        kernel,
        out_shape=(
            jax.ShapeDtypeStruct((BL, D), x.dtype),
            jax.ShapeDtypeStruct((NL, B * H, L, L), jnp.float32),
        ),
        grid=(NL,),
        in_specs=[
            fixed((BL, D)),                 # x
            per_layer((D, 3 * D)),          # Wqkv (fused q,k,v)
            per_layer((1, 3 * D)),          # bqkv
            per_layer((D, D)),              # Wo
            per_layer((1, D)),              # bo
            per_layer((D, d_ff)),           # W1
            per_layer((1, d_ff)),           # b1
            per_layer((d_ff, D)),           # W2
            per_layer((1, D)),              # b2
            per_layer((1, D)),              # norm1 gamma
            per_layer((1, D)),              # norm1 beta
            per_layer((1, D)),              # norm2 gamma
            per_layer((1, D)),              # norm2 beta
            fixed((1, D)),                  # final norm gamma
            fixed((1, D)),                  # final norm beta
        ],
        out_specs=(
            fixed((BL, D)),
            pl.BlockSpec((1, B * H, L, L), lambda l: (l, 0, 0, 0)),
        ),
        scratch_shapes=[
            pltpu.VMEM((BL, D), jnp.float32),       # residual stream (persists)
            pltpu.VMEM((BL, 3 * D), jnp.float32),   # fused QKV activations
            pltpu.VMEM((BL, D), jnp.float32),       # attention context
        ],
        compiler_params=pltpu.CompilerParams(
            dimension_semantics=("arbitrary",),     # layers are sequential
        ),
    )(x2d, params["Wqkv"], params["bqkv"], params["Wo"], params["bo"],
      params["W1"], params["b1"], params["W2"], params["b2"],
      params["g1"], params["be1"], params["g2"], params["be2"],
      params["gf"], params["bf"])

    out = out2d.reshape(B, L, D)
    attns = [attn_st[i].reshape(B, H, L, L) for i in range(NL)]
    return out, attns


# ----------------------------------------------------------------------------
# Deterministic parameter construction (fused QKV weight layout)
# ----------------------------------------------------------------------------
def init_params(key, num_layers, d_model, n_heads, d_ff):
    NL, D = num_layers, d_model
    ks = jax.random.split(key, 4)

    def nrm(k, shape):
        return 0.02 * jax.random.normal(k, shape, dtype=jnp.float32)

    return dict(
        Wqkv=nrm(ks[0], (NL, D, 3 * D)), bqkv=jnp.zeros((NL, 1, 3 * D), jnp.float32),
        Wo=nrm(ks[1], (NL, D, D)),       bo=jnp.zeros((NL, 1, D), jnp.float32),
        W1=nrm(ks[2], (NL, D, d_ff)),    b1=jnp.zeros((NL, 1, d_ff), jnp.float32),
        W2=nrm(ks[3], (NL, d_ff, D)),    b2=jnp.zeros((NL, 1, D), jnp.float32),
        g1=jnp.ones((NL, 1, D), jnp.float32), be1=jnp.zeros((NL, 1, D), jnp.float32),
        g2=jnp.ones((NL, 1, D), jnp.float32), be2=jnp.zeros((NL, 1, D), jnp.float32),
        gf=jnp.ones((1, D), jnp.float32),     bf=jnp.zeros((1, D), jnp.float32),
    )


# ----------------------------------------------------------------------------
# Pure-JAX reference (for a loose numerical sanity check)
# ----------------------------------------------------------------------------
def encoder_reference(x, params, n_heads):
    B, L, D = x.shape
    H = n_heads
    dh = D // H
    NL = params["Wqkv"].shape[0]
    eps = 1e-5

    def ln(y, g, b):
        m = jnp.mean(y, axis=-1, keepdims=True)
        v = jnp.mean(jnp.square(y - m), axis=-1, keepdims=True)
        return (y - m) / jnp.sqrt(v + eps) * g + b

    attns = []
    x2d = x.reshape(B * L, D)
    for i in range(NL):
        qkv = x2d @ params["Wqkv"][i] + params["bqkv"][i]
        q, k, v = jnp.split(qkv, 3, axis=-1)
        q = q.reshape(B, L, H, dh).transpose(0, 2, 1, 3)
        k = k.reshape(B, L, H, dh).transpose(0, 2, 1, 3)
        v = v.reshape(B, L, H, dh).transpose(0, 2, 1, 3)
        s = jnp.einsum("bhqd,bhkd->bhqk", q, k) / math.sqrt(dh)
        p = jax.nn.softmax(s, axis=-1)
        attns.append(p)
        ctx = jnp.einsum("bhqk,bhkd->bhqd", p, v).transpose(0, 2, 1, 3).reshape(B * L, D)
        new_x = ctx @ params["Wo"][i] + params["bo"][i]
        x1 = ln(x2d + new_x, params["g1"][i], params["be1"][i])
        h1 = jnp.maximum(x1 @ params["W1"][i] + params["b1"][i], 0.0)
        y2 = h1 @ params["W2"][i] + params["b2"][i]
        x2d = ln(x1 + y2, params["g2"][i], params["be2"][i])
    out = ln(x2d, params["gf"], params["bf"]).reshape(B, L, D)
    return out, attns


# ----------------------------------------------------------------------------
if __name__ == "__main__":
    B, L, D, H, D_FF, N_LAYERS = 2, 8, 32, 4, 64, 2

    key = jax.random.PRNGKey(0)
    k_x, k_p = jax.random.split(key)
    x = jax.random.normal(k_x, (B, L, D), dtype=jnp.float32)
    params = init_params(k_p, N_LAYERS, D, H, D_FF)

    out, attns = encoder_forward(x, params, n_heads=H)
    out = jax.block_until_ready(out)
    attns = [jax.block_until_ready(a) for a in attns]

    assert out.shape == (B, L, D)
    assert len(attns) == N_LAYERS and attns[0].shape == (B, H, L, L)

    # Loose-tolerance check vs. pure JAX (approx reciprocal in softmax + MXU precision).
    out_ref, attns_ref = encoder_reference(x, params, n_heads=H)
    assert np.allclose(np.asarray(out), np.asarray(out_ref), atol=2e-2, rtol=2e-2)
    for a, ar in zip(attns, attns_ref):
        assert np.allclose(np.asarray(a), np.asarray(ar), atol=2e-2, rtol=2e-2)

    print("KERNEL_OK")
</pallas_src>

<mosaic_0001>
module attributes {stable_mosaic.version = 11 : i64} {
  func.func @_encoder_kernel(%arg0: i32, %arg1: memref<16x32xf32, #tpu.memory_space<vmem>>, %arg2: memref<1x32x96xf32, #tpu.memory_space<vmem>>, %arg3: memref<1x1x96xf32, #tpu.memory_space<vmem>>, %arg4: memref<1x32x32xf32, #tpu.memory_space<vmem>>, %arg5: memref<1x1x32xf32, #tpu.memory_space<vmem>>, %arg6: memref<1x32x64xf32, #tpu.memory_space<vmem>>, %arg7: memref<1x1x64xf32, #tpu.memory_space<vmem>>, %arg8: memref<1x64x32xf32, #tpu.memory_space<vmem>>, %arg9: memref<1x1x32xf32, #tpu.memory_space<vmem>>, %arg10: memref<1x1x32xf32, #tpu.memory_space<vmem>>, %arg11: memref<1x1x32xf32, #tpu.memory_space<vmem>>, %arg12: memref<1x1x32xf32, #tpu.memory_space<vmem>>, %arg13: memref<1x1x32xf32, #tpu.memory_space<vmem>>, %arg14: memref<1x32xf32, #tpu.memory_space<vmem>>, %arg15: memref<1x32xf32, #tpu.memory_space<vmem>>, %arg16: memref<16x32xf32, #tpu.memory_space<vmem>>, %arg17: memref<1x8x8x8xf32, #tpu.memory_space<vmem>>, %arg18: memref<16x32xf32, #tpu.memory_space<vmem>>, %arg19: memref<16x96xf32, #tpu.memory_space<vmem>>, %arg20: memref<16x32xf32, #tpu.memory_space<vmem>>) attributes {dimension_semantics = [#tpu.dimension_semantics<arbitrary>], iteration_bounds = array<i64: 2>, scalar_prefetch = 0 : i64, scratch_operands = 3 : i64, tpu.core_type = #tpu.core_type<tc>, window_params = [{pipeline_mode = #tpu.pipeline_mode<synchronous>, transform_indices = @transform_0, window_bounds = array<i64: 16, 32>}, {transform_indices = @transform_1, window_bounds = array<i64: 1, 32, 96>}, {transform_indices = @transform_2, window_bounds = array<i64: 1, 1, 96>}, {transform_indices = @transform_3, window_bounds = array<i64: 1, 32, 32>}, {transform_indices = @transform_4, window_bounds = array<i64: 1, 1, 32>}, {transform_indices = @transform_5, window_bounds = array<i64: 1, 32, 64>}, {transform_indices = @transform_6, window_bounds = array<i64: 1, 1, 64>}, {transform_indices = @transform_7, window_bounds = array<i64: 1, 64, 32>}, {transform_indices = @transform_8, window_bounds = array<i64: 1, 1, 32>}, {transform_indices = @transform_9, window_bounds = array<i64: 1, 1, 32>}, {transform_indices = @transform_10, window_bounds = array<i64: 1, 1, 32>}, {transform_indices = @transform_11, window_bounds = array<i64: 1, 1, 32>}, {transform_indices = @transform_12, window_bounds = array<i64: 1, 1, 32>}, {pipeline_mode = #tpu.pipeline_mode<synchronous>, transform_indices = @transform_13, window_bounds = array<i64: 1, 32>}, {pipeline_mode = #tpu.pipeline_mode<synchronous>, transform_indices = @transform_14, window_bounds = array<i64: 1, 32>}, {pipeline_mode = #tpu.pipeline_mode<synchronous>, transform_indices = @transform_15, window_bounds = array<i64: 16, 32>}, {transform_indices = @transform_16, window_bounds = array<i64: 1, 8, 8, 8>}]} {
    %c0_i32 = arith.constant 0 : i32
    %0 = arith.cmpi eq, %arg0, %c0_i32 : i32
    %1 = arith.extui %0 : i1 to i32
    %c0_i32_0 = arith.constant 0 : i32
    %2 = arith.cmpi ne, %1, %c0_i32_0 : i32
    scf.if %2 {
      %c0_177 = arith.constant 0 : index
      %c0_178 = arith.constant 0 : index
      %262 = vector.load %arg1[%c0_177, %c0_178] : memref<16x32xf32, #tpu.memory_space<vmem>>, vector<16x32xf32>
      %c0_179 = arith.constant 0 : index
      %c0_180 = arith.constant 0 : index
      %263 = vector.load %arg18[%c0_179, %c0_180] : memref<16x32xf32, #tpu.memory_space<vmem>>, vector<16x32xf32>
      tpu.vector_store %arg18[%c0_179, %c0_180], %262 {strides = array<i32>} : memref<16x32xf32, #tpu.memory_space<vmem>>, vector<16x32xf32>,
    } else {
    }
    %c0 = arith.constant 0 : index
    %c0_1 = arith.constant 0 : index
    %3 = vector.load %arg18[%c0, %c0_1] : memref<16x32xf32, #tpu.memory_space<vmem>>, vector<16x32xf32>
    %c0_2 = arith.constant 0 : index
    %c0_3 = arith.constant 0 : index
    %c0_4 = arith.constant 0 : index
    %4 = vector.load %arg2[%c0_2, %c0_3, %c0_4] : memref<1x32x96xf32, #tpu.memory_space<vmem>>, vector<1x32x96xf32>
    %5 = vector.shape_cast %4 : vector<1x32x96xf32> to vector<32x96xf32>
    %cst = arith.constant dense<0.000000e+00> : vector<16x96xf32>
    %6 = tpu.matmul %3, %5, %cst {dimension_numbers = #tpu.dot_dimension_numbers<[1], [0], [0], [1], [0, 0, 1, 1], [], []>} : vector<16x32xf32>, vector<32x96xf32>, vector<16x96xf32> -> vector<16x96xf32>
    %c0_5 = arith.constant 0 : index
    %c0_6 = arith.constant 0 : index
    %c0_7 = arith.constant 0 : index
    %7 = vector.load %arg3[%c0_5, %c0_6, %c0_7] : memref<1x1x96xf32, #tpu.memory_space<vmem>>, vector<1x1x96xf32>
    %8 = vector.shape_cast %7 : vector<1x1x96xf32> to vector<1x96xf32>
    %9 = vector.broadcast %8 : vector<1x96xf32> to vector<16x96xf32>
    %10 = arith.addf %6, %9 : vector<16x96xf32>
    %c0_8 = arith.constant 0 : index
    %c0_9 = arith.constant 0 : index
    %11 = vector.load %arg19[%c0_8, %c0_9] : memref<16x96xf32, #tpu.memory_space<vmem>>, vector<16x96xf32>
    tpu.vector_store %arg19[%c0_8, %c0_9], %10 {strides = array<i32>} : memref<16x96xf32, #tpu.memory_space<vmem>>, vector<16x96xf32>,
    %c0_10 = arith.constant 0 : index
    %c0_11 = arith.constant 0 : index
    %12 = vector.load %arg19[%c0_10, %c0_11] : memref<16x96xf32, #tpu.memory_space<vmem>>, vector<8x8xf32>
    %c0_12 = arith.constant 0 : index
    %c32 = arith.constant 32 : index
    %13 = vector.load %arg19[%c0_12, %c32] : memref<16x96xf32, #tpu.memory_space<vmem>>, vector<8x8xf32>
    %c0_13 = arith.constant 0 : index
    %c64 = arith.constant 64 : index
    %14 = vector.load %arg19[%c0_13, %c64] : memref<16x96xf32, #tpu.memory_space<vmem>>, vector<8x8xf32>
    %cst_14 = arith.constant dense<0.000000e+00> : vector<8x8xf32>
    %15 = tpu.matmul %12, %13, %cst_14 {dimension_numbers = #tpu.dot_dimension_numbers<[1], [1], [0], [0], [0, 0, 1, 0], [], []>} : vector<8x8xf32>, vector<8x8xf32>, vector<8x8xf32> -> vector<8x8xf32>
    %cst_15 = arith.constant 0.353553385 : f32
    %16 = vector.broadcast %cst_15 : f32 to vector<8x8xf32>
    %17 = arith.mulf %15, %16 : vector<8x8xf32>
    %cst_16 = arith.constant dense<0xFF800000> : vector<8xf32>
    %18 = vector.multi_reduction <maximumf>, %17, %cst_16 [1] : vector<8x8xf32> to vector<8xf32>
    %19 = vector.shape_cast %18 : vector<8xf32> to vector<8x1xf32>
    %20 = vector.broadcast %19 : vector<8x1xf32> to vector<8x8xf32>
    %21 = arith.subf %17, %20 : vector<8x8xf32>
    %22 = math.exp %21 : vector<8x8xf32>
    %cst_17 = arith.constant dense<0.000000e+00> : vector<8xf32>
    %23 = vector.multi_reduction <add>, %22, %cst_17 [1] : vector<8x8xf32> to vector<8xf32>
    %24 = vector.shape_cast %23 : vector<8xf32> to vector<8x1xf32>
    %25 = tpu.reciprocal %24 {approx = true} : vector<8x1xf32> -> vector<8x1xf32>
    %26 = vector.broadcast %25 : vector<8x1xf32> to vector<8x8xf32>
    %27 = arith.mulf %22, %26 : vector<8x8xf32>
    %c0_18 = arith.constant 0 : index
    %c0_19 = arith.constant 0 : index
    %c0_20 = arith.constant 0 : index
    %c0_21 = arith.constant 0 : index
    %28 = vector.load %arg17[%c0_18, %c0_19, %c0_20, %c0_21] : memref<1x8x8x8xf32, #tpu.memory_space<vmem>>, vector<1x1x8x8xf32>
    %29 = vector.shape_cast %28 : vector<1x1x8x8xf32> to vector<8x8xf32>
    %30 = vector.shape_cast %27 : vector<8x8xf32> to vector<1x1x8x8xf32>
    tpu.vector_store %arg17[%c0_18, %c0_19, %c0_20, %c0_21], %30 {strides = array<i32>} : memref<1x8x8x8xf32, #tpu.memory_space<vmem>>, vector<1x1x8x8xf32>,
    %cst_22 = arith.constant dense<0.000000e+00> : vector<8x8xf32>
    %31 = tpu.matmul %27, %14, %cst_22 {dimension_numbers = #tpu.dot_dimension_numbers<[1], [0], [0], [1], [0, 0, 1, 1], [], []>} : vector<8x8xf32>, vector<8x8xf32>, vector<8x8xf32> -> vector<8x8xf32>
    %c0_23 = arith.constant 0 : index
    %c0_24 = arith.constant 0 : index
    %32 = vector.load %arg20[%c0_23, %c0_24] : memref<16x32xf32, #tpu.memory_space<vmem>>, vector<8x8xf32>
    tpu.vector_store %arg20[%c0_23, %c0_24], %31 {strides = array<i32>} : memref<16x32xf32, #tpu.memory_space<vmem>>, vector<8x8xf32>,
    %c0_25 = arith.constant 0 : index
    %c8 = arith.constant 8 : index
    %33 = vector.load %arg19[%c0_25, %c8] : memref<16x96xf32, #tpu.memory_space<vmem>>, vector<8x8xf32>
    %c0_26 = arith.constant 0 : index
    %c40 = arith.constant 40 : index
    %34 = vector.load %arg19[%c0_26, %c40] : memref<16x96xf32, #tpu.memory_space<vmem>>, vector<8x8xf32>
    %c0_27 = arith.constant 0 : index
    %c72 = arith.constant 72 : index
    %35 = vector.load %arg19[%c0_27, %c72] : memref<16x96xf32, #tpu.memory_space<vmem>>, vector<8x8xf32>
    %cst_28 = arith.constant dense<0.000000e+00> : vector<8x8xf32>
    %36 = tpu.matmul %33, %34, %cst_28 {dimension_numbers = #tpu.dot_dimension_numbers<[1], [1], [0], [0], [0, 0, 1, 0], [], []>} : vector<8x8xf32>, vector<8x8xf32>, vector<8x8xf32> -> vector<8x8xf32>
    %cst_29 = arith.constant 0.353553385 : f32
    %37 = vector.broadcast %cst_29 : f32 to vector<8x8xf32>
    %38 = arith.mulf %36, %37 : vector<8x8xf32>
    %cst_30 = arith.constant dense<0xFF800000> : vector<8xf32>
    %39 = vector.multi_reduction <maximumf>, %38, %cst_30 [1] : vector<8x8xf32> to vector<8xf32>
    %40 = vector.shape_cast %39 : vector<8xf32> to vector<8x1xf32>
    %41 = vector.broadcast %40 : vector<8x1xf32> to vector<8x8xf32>
    %42 = arith.subf %38, %41 : vector<8x8xf32>
    %43 = math.exp %42 : vector<8x8xf32>
    %cst_31 = arith.constant dense<0.000000e+00> : vector<8xf32>
    %44 = vector.multi_reduction <add>, %43, %cst_31 [1] : vector<8x8xf32> to vector<8xf32>
    %45 = vector.shape_cast %44 : vector<8xf32> to vector<8x1xf32>
    %46 = tpu.reciprocal %45 {approx = true} : vector<8x1xf32> -> vector<8x1xf32>
    %47 = vector.broadcast %46 : vector<8x1xf32> to vector<8x8xf32>
    %48 = arith.mulf %43, %47 : vector<8x8xf32>
    %c0_32 = arith.constant 0 : index
    %c1 = arith.constant 1 : index
    %c0_33 = arith.constant 0 : index
    %c0_34 = arith.constant 0 : index
    %49 = vector.load %arg17[%c0_32, %c1, %c0_33, %c0_34] : memref<1x8x8x8xf32, #tpu.memory_space<vmem>>, vector<1x1x8x8xf32>
    %50 = vector.shape_cast %49 : vector<1x1x8x8xf32> to vector<8x8xf32>
    %51 = vector.shape_cast %48 : vector<8x8xf32> to vector<1x1x8x8xf32>
    tpu.vector_store %arg17[%c0_32, %c1, %c0_33, %c0_34], %51 {strides = array<i32>} : memref<1x8x8x8xf32, #tpu.memory_space<vmem>>, vector<1x1x8x8xf32>,
    %cst_35 = arith.constant dense<0.000000e+00> : vector<8x8xf32>
    %52 = tpu.matmul %48, %35, %cst_35 {dimension_numbers = #tpu.dot_dimension_numbers<[1], [0], [0], [1], [0, 0, 1, 1], [], []>} : vector<8x8xf32>, vector<8x8xf32>, vector<8x8xf32> -> vector<8x8xf32>
    %c0_36 = arith.constant 0 : index
    %c8_37 = arith.constant 8 : index
    %53 = vector.load %arg20[%c0_36, %c8_37] : memref<16x32xf32, #tpu.memory_space<vmem>>, vector<8x8xf32>
    tpu.vector_store %arg20[%c0_36, %c8_37], %52 {strides = array<i32>} : memref<16x32xf32, #tpu.memory_space<vmem>>, vector<8x8xf32>,
    %c0_38 = arith.constant 0 : index
    %c16 = arith.constant 16 : index
    %54 = vector.load %arg19[%c0_38, %c16] : memref<16x96xf32, #tpu.memory_space<vmem>>, vector<8x8xf32>
    %c0_39 = arith.constant 0 : index
    %c48 = arith.constant 48 : index
    %55 = vector.load %arg19[%c0_39, %c48] : memref<16x96xf32, #tpu.memory_space<vmem>>, vector<8x8xf32>
    %c0_40 = arith.constant 0 : index
    %c80 = arith.constant 80 : index
    %56 = vector.load %arg19[%c0_40, %c80] : memref<16x96xf32, #tpu.memory_space<vmem>>, vector<8x8xf32>
    %cst_41 = arith.constant dense<0.000000e+00> : vector<8x8xf32>
    %57 = tpu.matmul %54, %55, %cst_41 {dimension_numbers = #tpu.dot_dimension_numbers<[1], [1], [0], [0], [0, 0, 1, 0], [], []>} : vector<8x8xf32>, vector<8x8xf32>, vector<8x8xf32> -> vector<8x8xf32>
    %cst_42 = arith.constant 0.353553385 : f32
    %58 = vector.broadcast %cst_42 : f32 to vector<8x8xf32>
    %59 = arith.mulf %57, %58 : vector<8x8xf32>
    %cst_43 = arith.constant dense<0xFF800000> : vector<8xf32>
    %60 = vector.multi_reduction <maximumf>, %59, %cst_43 [1] : vector<8x8xf32> to vector<8xf32>
    %61 = vector.shape_cast %60 : vector<8xf32> to vector<8x1xf32>
    %62 = vector.broadcast %61 : vector<8x1xf32> to vector<8x8xf32>
    %63 = arith.subf %59, %62 : vector<8x8xf32>
    %64 = math.exp %63 : vector<8x8xf32>
    %cst_44 = arith.constant dense<0.000000e+00> : vector<8xf32>
    %65 = vector.multi_reduction <add>, %64, %cst_44 [1] : vector<8x8xf32> to vector<8xf32>
    %66 = vector.shape_cast %65 : vector<8xf32> to vector<8x1xf32>
    %67 = tpu.reciprocal %66 {approx = true} : vector<8x1xf32> -> vector<8x1xf32>
    %68 = vector.broadcast %67 : vector<8x1xf32> to vector<8x8xf32>
    %69 = arith.mulf %64, %68 : vector<8x8xf32>
    %c0_45 = arith.constant 0 : index
    %c2 = arith.constant 2 : index
    %c0_46 = arith.constant 0 : index
    %c0_47 = arith.constant 0 : index
    %70 = vector.load %arg17[%c0_45, %c2, %c0_46, %c0_47] : memref<1x8x8x8xf32, #tpu.memory_space<vmem>>, vector<1x1x8x8xf32>
    %71 = vector.shape_cast %70 : vector<1x1x8x8xf32> to vector<8x8xf32>
    %72 = vector.shape_cast %69 : vector<8x8xf32> to vector<1x1x8x8xf32>
    tpu.vector_store %arg17[%c0_45, %c2, %c0_46, %c0_47], %72 {strides = array<i32>} : memref<1x8x8x8xf32, #tpu.memory_space<vmem>>, vector<1x1x8x8xf32>,
    %cst_48 = arith.constant dense<0.000000e+00> : vector<8x8xf32>
    %73 = tpu.matmul %69, %56, %cst_48 {dimension_numbers = #tpu.dot_dimension_numbers<[1], [0], [0], [1], [0, 0, 1, 1], [], []>} : vector<8x8xf32>, vector<8x8xf32>, vector<8x8xf32> -> vector<8x8xf32>
    %c0_49 = arith.constant 0 : index
    %c16_50 = arith.constant 16 : index
    %74 = vector.load %arg20[%c0_49, %c16_50] : memref<16x32xf32, #tpu.memory_space<vmem>>, vector<8x8xf32>
    tpu.vector_store %arg20[%c0_49, %c16_50], %73 {strides = array<i32>} : memref<16x32xf32, #tpu.memory_space<vmem>>, vector<8x8xf32>,
    %c0_51 = arith.constant 0 : index
    %c24 = arith.constant 24 : index
    %75 = vector.load %arg19[%c0_51, %c24] : memref<16x96xf32, #tpu.memory_space<vmem>>, vector<8x8xf32>
    %c0_52 = arith.constant 0 : index
    %c56 = arith.constant 56 : index
    %76 = vector.load %arg19[%c0_52, %c56] : memref<16x96xf32, #tpu.memory_space<vmem>>, vector<8x8xf32>
    %c0_53 = arith.constant 0 : index
    %c88 = arith.constant 88 : index
    %77 = vector.load %arg19[%c0_53, %c88] : memref<16x96xf32, #tpu.memory_space<vmem>>, vector<8x8xf32>
    %cst_54 = arith.constant dense<0.000000e+00> : vector<8x8xf32>
    %78 = tpu.matmul %75, %76, %cst_54 {dimension_numbers = #tpu.dot_dimension_numbers<[1], [1], [0], [0], [0, 0, 1, 0], [], []>} : vector<8x8xf32>, vector<8x8xf32>, vector<8x8xf32> -> vector<8x8xf32>
    %cst_55 = arith.constant 0.353553385 : f32
    %79 = vector.broadcast %cst_55 : f32 to vector<8x8xf32>
    %80 = arith.mulf %78, %79 : vector<8x8xf32>
    %cst_56 = arith.constant dense<0xFF800000> : vector<8xf32>
    %81 = vector.multi_reduction <maximumf>, %80, %cst_56 [1] : vector<8x8xf32> to vector<8xf32>
    %82 = vector.shape_cast %81 : vector<8xf32> to vector<8x1xf32>
    %83 = vector.broadcast %82 : vector<8x1xf32> to vector<8x8xf32>
    %84 = arith.subf %80, %83 : vector<8x8xf32>
    %85 = math.exp %84 : vector<8x8xf32>
    %cst_57 = arith.constant dense<0.000000e+00> : vector<8xf32>
    %86 = vector.multi_reduction <add>, %85, %cst_57 [1] : vector<8x8xf32> to vector<8xf32>
    %87 = vector.shape_cast %86 : vector<8xf32> to vector<8x1xf32>
    %88 = tpu.reciprocal %87 {approx = true} : vector<8x1xf32> -> vector<8x1xf32>
    %89 = vector.broadcast %88 : vector<8x1xf32> to vector<8x8xf32>
    %90 = arith.mulf %85, %89 : vector<8x8xf32>
    %c0_58 = arith.constant 0 : index
    %c3 = arith.constant 3 : index
    %c0_59 = arith.constant 0 : index
    %c0_60 = arith.constant 0 : index
    %91 = vector.load %arg17[%c0_58, %c3, %c0_59, %c0_60] : memref<1x8x8x8xf32, #tpu.memory_space<vmem>>, vector<1x1x8x8xf32>
    %92 = vector.shape_cast %91 : vector<1x1x8x8xf32> to vector<8x8xf32>
    %93 = vector.shape_cast %90 : vector<8x8xf32> to vector<1x1x8x8xf32>
    tpu.vector_store %arg17[%c0_58, %c3, %c0_59, %c0_60], %93 {strides = array<i32>} : memref<1x8x8x8xf32, #tpu.memory_space<vmem>>, vector<1x1x8x8xf32>,
    %cst_61 = arith.constant dense<0.000000e+00> : vector<8x8xf32>
    %94 = tpu.matmul %90, %77, %cst_61 {dimension_numbers = #tpu.dot_dimension_numbers<[1], [0], [0], [1], [0, 0, 1, 1], [], []>} : vector<8x8xf32>, vector<8x8xf32>, vector<8x8xf32> -> vector<8x8xf32>
    %c0_62 = arith.constant 0 : index
    %c24_63 = arith.constant 24 : index
    %95 = vector.load %arg20[%c0_62, %c24_63] : memref<16x32xf32, #tpu.memory_space<vmem>>, vector<8x8xf32>
    tpu.vector_store %arg20[%c0_62, %c24_63], %94 {strides = array<i32>} : memref<16x32xf32, #tpu.memory_space<vmem>>, vector<8x8xf32>,
    %c8_64 = arith.constant 8 : index
    %c0_65 = arith.constant 0 : index
    %96 = vector.load %arg19[%c8_64, %c0_65] : memref<16x96xf32, #tpu.memory_space<vmem>>, vector<8x8xf32>
    %c8_66 = arith.constant 8 : index
    %c32_67 = arith.constant 32 : index
    %97 = vector.load %arg19[%c8_66, %c32_67] : memref<16x96xf32, #tpu.memory_space<vmem>>, vector<8x8xf32>
    %c8_68 = arith.constant 8 : index
    %c64_69 = arith.constant 64 : index
    %98 = vector.load %arg19[%c8_68, %c64_69] : memref<16x96xf32, #tpu.memory_space<vmem>>, vector<8x8xf32>
    %cst_70 = arith.constant dense<0.000000e+00> : vector<8x8xf32>
    %99 = tpu.matmul %96, %97, %cst_70 {dimension_numbers = #tpu.dot_dimension_numbers<[1], [1], [0], [0], [0, 0, 1, 0], [], []>} : vector<8x8xf32>, vector<8x8xf32>, vector<8x8xf32> -> vector<8x8xf32>
    %cst_71 = arith.constant 0.353553385 : f32
    %100 = vector.broadcast %cst_71 : f32 to vector<8x8xf32>
    %101 = arith.mulf %99, %100 : vector<8x8xf32>
    %cst_72 = arith.constant dense<0xFF800000> : vector<8xf32>
    %102 = vector.multi_reduction <maximumf>, %101, %cst_72 [1] : vector<8x8xf32> to vector<8xf32>
    %103 = vector.shape_cast %102 : vector<8xf32> to vector<8x1xf32>
    %104 = vector.broadcast %103 : vector<8x1xf32> to vector<8x8xf32>
    %105 = arith.subf %101, %104 : vector<8x8xf32>
    %106 = math.exp %105 : vector<8x8xf32>
    %cst_73 = arith.constant dense<0.000000e+00> : vector<8xf32>
    %107 = vector.multi_reduction <add>, %106, %cst_73 [1] : vector<8x8xf32> to vector<8xf32>
    %108 = vector.shape_cast %107 : vector<8xf32> to vector<8x1xf32>
    %109 = tpu.reciprocal %108 {approx = true} : vector<8x1xf32> -> vector<8x1xf32>
    %110 = vector.broadcast %109 : vector<8x1xf32> to vector<8x8xf32>
    %111 = arith.mulf %106, %110 : vector<8x8xf32>
    %c0_74 = arith.constant 0 : index
    %c4 = arith.constant 4 : index
    %c0_75 = arith.constant 0 : index
    %c0_76 = arith.constant 0 : index
    %112 = vector.load %arg17[%c0_74, %c4, %c0_75, %c0_76] : memref<1x8x8x8xf32, #tpu.memory_space<vmem>>, vector<1x1x8x8xf32>
    %113 = vector.shape_cast %112 : vector<1x1x8x8xf32> to vector<8x8xf32>
    %114 = vector.shape_cast %111 : vector<8x8xf32> to vector<1x1x8x8xf32>
    tpu.vector_store %arg17[%c0_74, %c4, %c0_75, %c0_76], %114 {strides = array<i32>} : memref<1x8x8x8xf32, #tpu.memory_space<vmem>>, vector<1x1x8x8xf32>,
    %cst_77 = arith.constant dense<0.000000e+00> : vector<8x8xf32>
    %115 = tpu.matmul %111, %98, %cst_77 {dimension_numbers = #tpu.dot_dimension_numbers<[1], [0], [0], [1], [0, 0, 1, 1], [], []>} : vector<8x8xf32>, vector<8x8xf32>, vector<8x8xf32> -> vector<8x8xf32>
    %c8_78 = arith.constant 8 : index
    %c0_79 = arith.constant 0 : index
    %116 = vector.load %arg20[%c8_78, %c0_79] : memref<16x32xf32, #tpu.memory_space<vmem>>, vector<8x8xf32>
    tpu.vector_store %arg20[%c8_78, %c0_79], %115 {strides = array<i32>} : memref<16x32xf32, #tpu.memory_space<vmem>>, vector<8x8xf32>,
    %c8_80 = arith.constant 8 : index
    %c8_81 = arith.constant 8 : index
    %117 = vector.load %arg19[%c8_80, %c8_81] : memref<16x96xf32, #tpu.memory_space<vmem>>, vector<8x8xf32>
    %c8_82 = arith.constant 8 : index
    %c40_83 = arith.constant 40 : index
    %118 = vector.load %arg19[%c8_82, %c40_83] : memref<16x96xf32, #tpu.memory_space<vmem>>, vector<8x8xf32>
    %c8_84 = arith.constant 8 : index
    %c72_85 = arith.constant 72 : index
    %119 = vector.load %arg19[%c8_84, %c72_85] : memref<16x96xf32, #tpu.memory_space<vmem>>, vector<8x8xf32>
    %cst_86 = arith.constant dense<0.000000e+00> : vector<8x8xf32>
    %120 = tpu.matmul %117, %118, %cst_86 {dimension_numbers = #tpu.dot_dimension_numbers<[1], [1], [0], [0], [0, 0, 1, 0], [], []>} : vector<8x8xf32>, vector<8x8xf32>, vector<8x8xf32> -> vector<8x8xf32>
    %cst_87 = arith.constant 0.353553385 : f32
    %121 = vector.broadcast %cst_87 : f32 to vector<8x8xf32>
    %122 = arith.mulf %120, %121 : vector<8x8xf32>
    %cst_88 = arith.constant dense<0xFF800000> : vector<8xf32>
    %123 = vector.multi_reduction <maximumf>, %122, %cst_88 [1] : vector<8x8xf32> to vector<8xf32>
    %124 = vector.shape_cast %123 : vector<8xf32> to vector<8x1xf32>
    %125 = vector.broadcast %124 : vector<8x1xf32> to vector<8x8xf32>
    %126 = arith.subf %122, %125 : vector<8x8xf32>
    %127 = math.exp %126 : vector<8x8xf32>
    %cst_89 = arith.constant dense<0.000000e+00> : vector<8xf32>
    %128 = vector.multi_reduction <add>, %127, %cst_89 [1] : vector<8x8xf32> to vector<8xf32>
    %129 = vector.shape_cast %128 : vector<8xf32> to vector<8x1xf32>
    %130 = tpu.reciprocal %129 {approx = true} : vector<8x1xf32> -> vector<8x1xf32>
    %131 = vector.broadcast %130 : vector<8x1xf32> to vector<8x8xf32>
    %132 = arith.mulf %127, %131 : vector<8x8xf32>
    %c0_90 = arith.constant 0 : index
    %c5 = arith.constant 5 : index
    %c0_91 = arith.constant 0 : index
    %c0_92 = arith.constant 0 : index
    %133 = vector.load %arg17[%c0_90, %c5, %c0_91, %c0_92] : memref<1x8x8x8xf32, #tpu.memory_space<vmem>>, vector<1x1x8x8xf32>
    %134 = vector.shape_cast %133 : vector<1x1x8x8xf32> to vector<8x8xf32>
    %135 = vector.shape_cast %132 : vector<8x8xf32> to vector<1x1x8x8xf32>
    tpu.vector_store %arg17[%c0_90, %c5, %c0_91, %c0_92], %135 {strides = array<i32>} : memref<1x8x8x8xf32, #tpu.memory_space<vmem>>, vector<1x1x8x8xf32>,
    %cst_93 = arith.constant dense<0.000000e+00> : vector<8x8xf32>
    %136 = tpu.matmul %132, %119, %cst_93 {dimension_numbers = #tpu.dot_dimension_numbers<[1], [0], [0], [1], [0, 0, 1, 1], [], []>} : vector<8x8xf32>, vector<8x8xf32>, vector<8x8xf32> -> vector<8x8xf32>
    %c8_94 = arith.constant 8 : index
    %c8_95 = arith.constant 8 : index
    %137 = vector.load %arg20[%c8_94, %c8_95] : memref<16x32xf32, #tpu.memory_space<vmem>>, vector<8x8xf32>
    tpu.vector_store %arg20[%c8_94, %c8_95], %136 {strides = array<i32>} : memref<16x32xf32, #tpu.memory_space<vmem>>, vector<8x8xf32>,
    %c8_96 = arith.constant 8 : index
    %c16_97 = arith.constant 16 : index
    %138 = vector.load %arg19[%c8_96, %c16_97] : memref<16x96xf32, #tpu.memory_space<vmem>>, vector<8x8xf32>
    %c8_98 = arith.constant 8 : index
    %c48_99 = arith.constant 48 : index
    %139 = vector.load %arg19[%c8_98, %c48_99] : memref<16x96xf32, #tpu.memory_space<vmem>>, vector<8x8xf32>
    %c8_100 = arith.constant 8 : index
    %c80_101 = arith.constant 80 : index
    %140 = vector.load %arg19[%c8_100, %c80_101] : memref<16x96xf32, #tpu.memory_space<vmem>>, vector<8x8xf32>
    %cst_102 = arith.constant dense<0.000000e+00> : vector<8x8xf32>
    %141 = tpu.matmul %138, %139, %cst_102 {dimension_numbers = #tpu.dot_dimension_numbers<[1], [1], [0], [0], [0, 0, 1, 0], [], []>} : vector<8x8xf32>, vector<8x8xf32>, vector<8x8xf32> -> vector<8x8xf32>
    %cst_103 = arith.constant 0.353553385 : f32
    %142 = vector.broadcast %cst_103 : f32 to vector<8x8xf32>
    %143 = arith.mulf %141, %142 : vector<8x8xf32>
    %cst_104 = arith.constant dense<0xFF800000> : vector<8xf32>
    %144 = vector.multi_reduction <maximumf>, %143, %cst_104 [1] : vector<8x8xf32> to vector<8xf32>
    %145 = vector.shape_cast %144 : vector<8xf32> to vector<8x1xf32>
    %146 = vector.broadcast %145 : vector<8x1xf32> to vector<8x8xf32>
    %147 = arith.subf %143, %146 : vector<8x8xf32>
    %148 = math.exp %147 : vector<8x8xf32>
    %cst_105 = arith.constant dense<0.000000e+00> : vector<8xf32>
    %149 = vector.multi_reduction <add>, %148, %cst_105 [1] : vector<8x8xf32> to vector<8xf32>
    %150 = vector.shape_cast %149 : vector<8xf32> to vector<8x1xf32>
    %151 = tpu.reciprocal %150 {approx = true} : vector<8x1xf32> -> vector<8x1xf32>
    %152 = vector.broadcast %151 : vector<8x1xf32> to vector<8x8xf32>
    %153 = arith.mulf %148, %152 : vector<8x8xf32>
    %c0_106 = arith.constant 0 : index
    %c6 = arith.constant 6 : index
    %c0_107 = arith.constant 0 : index
    %c0_108 = arith.constant 0 : index
    %154 = vector.load %arg17[%c0_106, %c6, %c0_107, %c0_108] : memref<1x8x8x8xf32, #tpu.memory_space<vmem>>, vector<1x1x8x8xf32>
    %155 = vector.shape_cast %154 : vector<1x1x8x8xf32> to vector<8x8xf32>
    %156 = vector.shape_cast %153 : vector<8x8xf32> to vector<1x1x8x8xf32>
    tpu.vector_store %arg17[%c0_106, %c6, %c0_107, %c0_108], %156 {strides = array<i32>} : memref<1x8x8x8xf32, #tpu.memory_space<vmem>>, vector<1x1x8x8xf32>,
    %cst_109 = arith.constant dense<0.000000e+00> : vector<8x8xf32>
    %157 = tpu.matmul %153, %140, %cst_109 {dimension_numbers = #tpu.dot_dimension_numbers<[1], [0], [0], [1], [0, 0, 1, 1], [], []>} : vector<8x8xf32>, vector<8x8xf32>, vector<8x8xf32> -> vector<8x8xf32>
    %c8_110 = arith.constant 8 : index
    %c16_111 = arith.constant 16 : index
    %158 = vector.load %arg20[%c8_110, %c16_111] : memref<16x32xf32, #tpu.memory_space<vmem>>, vector<8x8xf32>
    tpu.vector_store %arg20[%c8_110, %c16_111], %157 {strides = array<i32>} : memref<16x32xf32, #tpu.memory_space<vmem>>, vector<8x8xf32>,
    %c8_112 = arith.constant 8 : index
    %c24_113 = arith.constant 24 : index
    %159 = vector.load %arg19[%c8_112, %c24_113] : memref<16x96xf32, #tpu.memory_space<vmem>>, vector<8x8xf32>
    %c8_114 = arith.constant 8 : index
    %c56_115 = arith.constant 56 : index
    %160 = vector.load %arg19[%c8_114, %c56_115] : memref<16x96xf32, #tpu.memory_space<vmem>>, vector<8x8xf32>
    %c8_116 = arith.constant 8 : index
    %c88_117 = arith.constant 88 : index
    %161 = vector.load %arg19[%c8_116, %c88_117] : memref<16x96xf32, #tpu.memory_space<vmem>>, vector<8x8xf32>
    %cst_118 = arith.constant dense<0.000000e+00> : vector<8x8xf32>
    %162 = tpu.matmul %159, %160, %cst_118 {dimension_numbers = #tpu.dot_dimension_numbers<[1], [1], [0], [0], [0, 0, 1, 0], [], []>} : vector<8x8xf32>, vector<8x8xf32>, vector<8x8xf32> -> vector<8x8xf32>
    %cst_119 = arith.constant 0.353553385 : f32
    %163 = vector.broadcast %cst_119 : f32 to vector<8x8xf32>
    %164 = arith.mulf %162, %163 : vector<8x8xf32>
    %cst_120 = arith.constant dense<0xFF800000> : vector<8xf32>
    %165 = vector.multi_reduction <maximumf>, %164, %cst_120 [1] : vector<8x8xf32> to vector<8xf32>
    %166 = vector.shape_cast %165 : vector<8xf32> to vector<8x1xf32>
    %167 = vector.broadcast %166 : vector<8x1xf32> to vector<8x8xf32>
    %168 = arith.subf %164, %167 : vector<8x8xf32>
    %169 = math.exp %168 : vector<8x8xf32>
    %cst_121 = arith.constant dense<0.000000e+00> : vector<8xf32>
    %170 = vector.multi_reduction <add>, %169, %cst_121 [1] : vector<8x8xf32> to vector<8xf32>
    %171 = vector.shape_cast %170 : vector<8xf32> to vector<8x1xf32>
    %172 = tpu.reciprocal %171 {approx = true} : vector<8x1xf32> -> vector<8x1xf32>
    %173 = vector.broadcast %172 : vector<8x1xf32> to vector<8x8xf32>
    %174 = arith.mulf %169, %173 : vector<8x8xf32>
    %c0_122 = arith.constant 0 : index
    %c7 = arith.constant 7 : index
    %c0_123 = arith.constant 0 : index
    %c0_124 = arith.constant 0 : index
    %175 = vector.load %arg17[%c0_122, %c7, %c0_123, %c0_124] : memref<1x8x8x8xf32, #tpu.memory_space<vmem>>, vector<1x1x8x8xf32>
    %176 = vector.shape_cast %175 : vector<1x1x8x8xf32> to vector<8x8xf32>
    %177 = vector.shape_cast %174 : vector<8x8xf32> to vector<1x1x8x8xf32>
    tpu.vector_store %arg17[%c0_122, %c7, %c0_123, %c0_124], %177 {strides = array<i32>} : memref<1x8x8x8xf32, #tpu.memory_space<vmem>>, vector<1x1x8x8xf32>,
    %cst_125 = arith.constant dense<0.000000e+00> : vector<8x8xf32>
    %178 = tpu.matmul %174, %161, %cst_125 {dimension_numbers = #tpu.dot_dimension_numbers<[1], [0], [0], [1], [0, 0, 1, 1], [], []>} : vector<8x8xf32>, vector<8x8xf32>, vector<8x8xf32> -> vector<8x8xf32>
    %c8_126 = arith.constant 8 : index
    %c24_127 = arith.constant 24 : index
    %179 = vector.load %arg20[%c8_126, %c24_127] : memref<16x32xf32, #tpu.memory_space<vmem>>, vector<8x8xf32>
    tpu.vector_store %arg20[%c8_126, %c24_127], %178 {strides = array<i32>} : memref<16x32xf32, #tpu.memory_space<vmem>>, vector<8x8xf32>,
    %c0_128 = arith.constant 0 : index
    %c0_129 = arith.constant 0 : index
    %180 = vector.load %arg20[%c0_128, %c0_129] : memref<16x32xf32, #tpu.memory_space<vmem>>, vector<16x32xf32>
    %c0_130 = arith.constant 0 : index
    %c0_131 = arith.constant 0 : index
    %c0_132 = arith.constant 0 : index
    %181 = vector.load %arg4[%c0_130, %c0_131, %c0_132] : memref<1x32x32xf32, #tpu.memory_space<vmem>>, vector<1x32x32xf32>
    %182 = vector.shape_cast %181 : vector<1x32x32xf32> to vector<32x32xf32>
    %cst_133 = arith.constant dense<0.000000e+00> : vector<16x32xf32>
    %183 = tpu.matmul %180, %182, %cst_133 {dimension_numbers = #tpu.dot_dimension_numbers<[1], [0], [0], [1], [0, 0, 1, 1], [], []>} : vector<16x32xf32>, vector<32x32xf32>, vector<16x32xf32> -> vector<16x32xf32>
    %c0_134 = arith.constant 0 : index
    %c0_135 = arith.constant 0 : index
    %c0_136 = arith.constant 0 : index
    %184 = vector.load %arg5[%c0_134, %c0_135, %c0_136] : memref<1x1x32xf32, #tpu.memory_space<vmem>>, vector<1x1x32xf32>
    %185 = vector.shape_cast %184 : vector<1x1x32xf32> to vector<1x32xf32>
    %186 = vector.broadcast %185 : vector<1x32xf32> to vector<16x32xf32>
    %187 = arith.addf %183, %186 : vector<16x32xf32>
    %188 = arith.addf %3, %187 : vector<16x32xf32>
    %c0_137 = arith.constant 0 : index
    %c0_138 = arith.constant 0 : index
    %c0_139 = arith.constant 0 : index
    %189 = vector.load %arg10[%c0_137, %c0_138, %c0_139] : memref<1x1x32xf32, #tpu.memory_space<vmem>>, vector<1x1x32xf32>
    %190 = vector.shape_cast %189 : vector<1x1x32xf32> to vector<1x32xf32>
    %c0_140 = arith.constant 0 : index
    %c0_141 = arith.constant 0 : index
    %c0_142 = arith.constant 0 : index
    %191 = vector.load %arg11[%c0_140, %c0_141, %c0_142] : memref<1x1x32xf32, #tpu.memory_space<vmem>>, vector<1x1x32xf32>
    %192 = vector.shape_cast %191 : vector<1x1x32xf32> to vector<1x32xf32>
    %cst_143 = arith.constant dense<0.000000e+00> : vector<16xf32>
    %193 = vector.multi_reduction <add>, %188, %cst_143 [1] : vector<16x32xf32> to vector<16xf32>
    %194 = vector.shape_cast %193 : vector<16xf32> to vector<16x1xf32>
    %cst_144 = arith.constant 3.200000e+01 : f32
    %195 = vector.broadcast %cst_144 : f32 to vector<16x1xf32>
    %196 = arith.divf %194, %195 : vector<16x1xf32>
    %197 = vector.broadcast %196 : vector<16x1xf32> to vector<16x32xf32>
    %198 = arith.subf %188, %197 : vector<16x32xf32>
    %199 = arith.mulf %198, %198 : vector<16x32xf32>
    %cst_145 = arith.constant dense<0.000000e+00> : vector<16xf32>
    %200 = vector.multi_reduction <add>, %199, %cst_145 [1] : vector<16x32xf32> to vector<16xf32>
    %201 = vector.shape_cast %200 : vector<16xf32> to vector<16x1xf32>
    %cst_146 = arith.constant 3.200000e+01 : f32
    %202 = vector.broadcast %cst_146 : f32 to vector<16x1xf32>
    %203 = arith.divf %201, %202 : vector<16x1xf32>
    %204 = vector.broadcast %196 : vector<16x1xf32> to vector<16x32xf32>
    %205 = arith.subf %188, %204 : vector<16x32xf32>
    %cst_147 = arith.constant 9.99999974E-6 : f32
    %206 = vector.broadcast %cst_147 : f32 to vector<16x1xf32>
    %207 = arith.addf %203, %206 : vector<16x1xf32>
    %208 = math.rsqrt %207 : vector<16x1xf32>
    %209 = vector.broadcast %208 : vector<16x1xf32> to vector<16x32xf32>
    %210 = arith.mulf %205, %209 : vector<16x32xf32>
    %211 = vector.broadcast %190 : vector<1x32xf32> to vector<16x32xf32>
    %212 = arith.mulf %210, %211 : vector<16x32xf32>
    %213 = vector.broadcast %192 : vector<1x32xf32> to vector<16x32xf32>
    %214 = arith.addf %212, %213 : vector<16x32xf32>
    %c0_148 = arith.constant 0 : index
    %c0_149 = arith.constant 0 : index
    %c0_150 = arith.constant 0 : index
    %215 = vector.load %arg6[%c0_148, %c0_149, %c0_150] : memref<1x32x64xf32, #tpu.memory_space<vmem>>, vector<1x32x64xf32>
    %216 = vector.shape_cast %215 : vector<1x32x64xf32> to vector<32x64xf32>
    %cst_151 = arith.constant dense<0.000000e+00> : vector<16x64xf32>
    %217 = tpu.matmul %214, %216, %cst_151 {dimension_numbers = #tpu.dot_dimension_numbers<[1], [0], [0], [1], [0, 0, 1, 1], [], []>} : vector<16x32xf32>, vector<32x64xf32>, vector<16x64xf32> -> vector<16x64xf32>
    %c0_152 = arith.constant 0 : index
    %c0_153 = arith.constant 0 : index
    %c0_154 = arith.constant 0 : index
    %218 = vector.load %arg7[%c0_152, %c0_153, %c0_154] : memref<1x1x64xf32, #tpu.memory_space<vmem>>, vector<1x1x64xf32>
    %219 = vector.shape_cast %218 : vector<1x1x64xf32> to vector<1x64xf32>
    %220 = vector.broadcast %219 : vector<1x64xf32> to vector<16x64xf32>
    %221 = arith.addf %217, %220 : vector<16x64xf32>
    %cst_155 = arith.constant 0.000000e+00 : f32
    %222 = vector.broadcast %cst_155 : f32 to vector<16x64xf32>
    %223 = arith.maximumf %221, %222 : vector<16x64xf32>
    %c0_156 = arith.constant 0 : index
    %c0_157 = arith.constant 0 : index
    %c0_158 = arith.constant 0 : index
    %224 = vector.load %arg8[%c0_156, %c0_157, %c0_158] : memref<1x64x32xf32, #tpu.memory_space<vmem>>, vector<1x64x32xf32>
    %225 = vector.shape_cast %224 : vector<1x64x32xf32> to vector<64x32xf32>
    %cst_159 = arith.constant dense<0.000000e+00> : vector<16x32xf32>
    %226 = tpu.matmul %223, %225, %cst_159 {dimension_numbers = #tpu.dot_dimension_numbers<[1], [0], [0], [1], [0, 0, 1, 1], [], []>} : vector<16x64xf32>, vector<64x32xf32>, vector<16x32xf32> -> vector<16x32xf32>
    %c0_160 = arith.constant 0 : index
    %c0_161 = arith.constant 0 : index
    %c0_162 = arith.constant 0 : index
    %227 = vector.load %arg9[%c0_160, %c0_161, %c0_162] : memref<1x1x32xf32, #tpu.memory_space<vmem>>, vector<1x1x32xf32>
    %228 = vector.shape_cast %227 : vector<1x1x32xf32> to vector<1x32xf32>
    %229 = vector.broadcast %228 : vector<1x32xf32> to vector<16x32xf32>
    %230 = arith.addf %226, %229 : vector<16x32xf32>
    %231 = arith.addf %214, %230 : vector<16x32xf32>
    %c0_163 = arith.constant 0 : index
    %c0_164 = arith.constant 0 : index
    %c0_165 = arith.constant 0 : index
    %232 = vector.load %arg12[%c0_163, %c0_164, %c0_165] : memref<1x1x32xf32, #tpu.memory_space<vmem>>, vector<1x1x32xf32>
    %233 = vector.shape_cast %232 : vector<1x1x32xf32> to vector<1x32xf32>
    %c0_166 = arith.constant 0 : index
    %c0_167 = arith.constant 0 : index
    %c0_168 = arith.constant 0 : index
    %234 = vector.load %arg13[%c0_166, %c0_167, %c0_168] : memref<1x1x32xf32, #tpu.memory_space<vmem>>, vector<1x1x32xf32>
    %235 = vector.shape_cast %234 : vector<1x1x32xf32> to vector<1x32xf32>
    %cst_169 = arith.constant dense<0.000000e+00> : vector<16xf32>
    %236 = vector.multi_reduction <add>, %231, %cst_169 [1] : vector<16x32xf32> to vector<16xf32>
    %237 = vector.shape_cast %236 : vector<16xf32> to vector<16x1xf32>
    %cst_170 = arith.constant 3.200000e+01 : f32
    %238 = vector.broadcast %cst_170 : f32 to vector<16x1xf32>
    %239 = arith.divf %237, %238 : vector<16x1xf32>
    %240 = vector.broadcast %239 : vector<16x1xf32> to vector<16x32xf32>
    %241 = arith.subf %231, %240 : vector<16x32xf32>
    %242 = arith.mulf %241, %241 : vector<16x32xf32>
    %cst_171 = arith.constant dense<0.000000e+00> : vector<16xf32>
    %243 = vector.multi_reduction <add>, %242, %cst_171 [1] : vector<16x32xf32> to vector<16xf32>
    %244 = vector.shape_cast %243 : vector<16xf32> to vector<16x1xf32>
    %cst_172 = arith.constant 3.200000e+01 : f32
    %245 = vector.broadcast %cst_172 : f32 to vector<16x1xf32>
    %246 = arith.divf %244, %245 : vector<16x1xf32>
    %247 = vector.broadcast %239 : vector<16x1xf32> to vector<16x32xf32>
    %248 = arith.subf %231, %247 : vector<16x32xf32>
    %cst_173 = arith.constant 9.99999974E-6 : f32
    %249 = vector.broadcast %cst_173 : f32 to vector<16x1xf32>
    %250 = arith.addf %246, %249 : vector<16x1xf32>
    %251 = math.rsqrt %250 : vector<16x1xf32>
    %252 = vector.broadcast %251 : vector<16x1xf32> to vector<16x32xf32>
    %253 = arith.mulf %248, %252 : vector<16x32xf32>
    %254 = vector.broadcast %233 : vector<1x32xf32> to vector<16x32xf32>
    %255 = arith.mulf %253, %254 : vector<16x32xf32>
    %256 = vector.broadcast %235 : vector<1x32xf32> to vector<16x32xf32>
    %257 = arith.addf %255, %256 : vector<16x32xf32>
    %c0_174 = arith.constant 0 : index
    %c0_175 = arith.constant 0 : index
    %258 = vector.load %arg18[%c0_174, %c0_175] : memref<16x32xf32, #tpu.memory_space<vmem>>, vector<16x32xf32>
    tpu.vector_store %arg18[%c0_174, %c0_175], %257 {strides = array<i32>} : memref<16x32xf32, #tpu.memory_space<vmem>>, vector<16x32xf32>,
    %c1_i32 = arith.constant 1 : i32
    %259 = arith.cmpi eq, %arg0, %c1_i32 : i32
    %260 = arith.extui %259 : i1 to i32
    %c0_i32_176 = arith.constant 0 : i32
    %261 = arith.cmpi ne, %260, %c0_i32_176 : i32
    scf.if %261 {
      %c0_177 = arith.constant 0 : index
      %c0_178 = arith.constant 0 : index
      %262 = vector.load %arg14[%c0_177, %c0_178] : memref<1x32xf32, #tpu.memory_space<vmem>>, vector<1x32xf32>
      %c0_179 = arith.constant 0 : index
      %c0_180 = arith.constant 0 : index
      %263 = vector.load %arg15[%c0_179, %c0_180] : memref<1x32xf32, #tpu.memory_space<vmem>>, vector<1x32xf32>
      %cst_181 = arith.constant dense<0.000000e+00> : vector<16xf32>
      %264 = vector.multi_reduction <add>, %257, %cst_181 [1] : vector<16x32xf32> to vector<16xf32>
      %265 = vector.shape_cast %264 : vector<16xf32> to vector<16x1xf32>
      %cst_182 = arith.constant 3.200000e+01 : f32
      %266 = vector.broadcast %cst_182 : f32 to vector<16x1xf32>
      %267 = arith.divf %265, %266 : vector<16x1xf32>
      %268 = vector.broadcast %267 : vector<16x1xf32> to vector<16x32xf32>
      %269 = arith.subf %257, %268 : vector<16x32xf32>
      %270 = arith.mulf %269, %269 : vector<16x32xf32>
      %cst_183 = arith.constant dense<0.000000e+00> : vector<16xf32>
      %271 = vector.multi_reduction <add>, %270, %cst_183 [1] : vector<16x32xf32> to vector<16xf32>
      %272 = vector.shape_cast %271 : vector<16xf32> to vector<16x1xf32>
      %cst_184 = arith.constant 3.200000e+01 : f32
      %273 = vector.broadcast %cst_184 : f32 to vector<16x1xf32>
      %274 = arith.divf %272, %273 : vector<16x1xf32>
      %275 = vector.broadcast %267 : vector<16x1xf32> to vector<16x32xf32>
      %276 = arith.subf %257, %275 : vector<16x32xf32>
      %cst_185 = arith.constant 9.99999974E-6 : f32
      %277 = vector.broadcast %cst_185 : f32 to vector<16x1xf32>
      %278 = arith.addf %274, %277 : vector<16x1xf32>
      %279 = math.rsqrt %278 : vector<16x1xf32>
      %280 = vector.broadcast %279 : vector<16x1xf32> to vector<16x32xf32>
      %281 = arith.mulf %276, %280 : vector<16x32xf32>
      %282 = vector.broadcast %262 : vector<1x32xf32> to vector<16x32xf32>
      %283 = arith.mulf %281, %282 : vector<16x32xf32>
      %284 = vector.broadcast %263 : vector<1x32xf32> to vector<16x32xf32>
      %285 = arith.addf %283, %284 : vector<16x32xf32>
      %c0_186 = arith.constant 0 : index
      %c0_187 = arith.constant 0 : index
      %286 = vector.load %arg16[%c0_186, %c0_187] : memref<16x32xf32, #tpu.memory_space<vmem>>, vector<16x32xf32>
      tpu.vector_store %arg16[%c0_186, %c0_187], %285 {strides = array<i32>} : memref<16x32xf32, #tpu.memory_space<vmem>>, vector<16x32xf32>,
    } else {
    }
    return
  }
  func.func @transform_0(%arg0: i32) -> (i32, i32) {
    %c0_i32 = arith.constant 0 : i32
    %c0_i32_0 = arith.constant 0 : i32
    %c0_i32_1 = arith.constant 0 : i32
    return %c0_i32, %c0_i32_0 : i32, i32
  }
  func.func @transform_1(%arg0: i32) -> (i32, i32, i32) {
    %c0_i32 = arith.constant 0 : i32
    %c0_i32_0 = arith.constant 0 : i32
    %c0_i32_1 = arith.constant 0 : i32
    return %arg0, %c0_i32, %c0_i32_0 : i32, i32, i32
  }
  func.func @transform_2(%arg0: i32) -> (i32, i32, i32) {
    %c0_i32 = arith.constant 0 : i32
    %c0_i32_0 = arith.constant 0 : i32
    %c0_i32_1 = arith.constant 0 : i32
    return %arg0, %c0_i32, %c0_i32_0 : i32, i32, i32
  }
  func.func @transform_3(%arg0: i32) -> (i32, i32, i32) {
    %c0_i32 = arith.constant 0 : i32
    %c0_i32_0 = arith.constant 0 : i32
    %c0_i32_1 = arith.constant 0 : i32
    return %arg0, %c0_i32, %c0_i32_0 : i32, i32, i32
  }
  func.func @transform_4(%arg0: i32) -> (i32, i32, i32) {
    %c0_i32 = arith.constant 0 : i32
    %c0_i32_0 = arith.constant 0 : i32
    %c0_i32_1 = arith.constant 0 : i32
    return %arg0, %c0_i32, %c0_i32_0 : i32, i32, i32
  }
  func.func @transform_5(%arg0: i32) -> (i32, i32, i32) {
    %c0_i32 = arith.constant 0 : i32
    %c0_i32_0 = arith.constant 0 : i32
    %c0_i32_1 = arith.constant 0 : i32
    return %arg0, %c0_i32, %c0_i32_0 : i32, i32, i32
  }
  func.func @transform_6(%arg0: i32) -> (i32, i32, i32) {
    %c0_i32 = arith.constant 0 : i32
    %c0_i32_0 = arith.constant 0 : i32
    %c0_i32_1 = arith.constant 0 : i32
    return %arg0, %c0_i32, %c0_i32_0 : i32, i32, i32
  }
  func.func @transform_7(%arg0: i32) -> (i32, i32, i32) {
    %c0_i32 = arith.constant 0 : i32
    %c0_i32_0 = arith.constant 0 : i32
    %c0_i32_1 = arith.constant 0 : i32
    return %arg0, %c0_i32, %c0_i32_0 : i32, i32, i32
  }
  func.func @transform_8(%arg0: i32) -> (i32, i32, i32) {
    %c0_i32 = arith.constant 0 : i32
    %c0_i32_0 = arith.constant 0 : i32
    %c0_i32_1 = arith.constant 0 : i32
    return %arg0, %c0_i32, %c0_i32_0 : i32, i32, i32
  }
  func.func @transform_9(%arg0: i32) -> (i32, i32, i32) {
    %c0_i32 = arith.constant 0 : i32
    %c0_i32_0 = arith.constant 0 : i32
    %c0_i32_1 = arith.constant 0 : i32
    return %arg0, %c0_i32, %c0_i32_0 : i32, i32, i32
  }
  func.func @transform_10(%arg0: i32) -> (i32, i32, i32) {
    %c0_i32 = arith.constant 0 : i32
    %c0_i32_0 = arith.constant 0 : i32
    %c0_i32_1 = arith.constant 0 : i32
    return %arg0, %c0_i32, %c0_i32_0 : i32, i32, i32
  }
  func.func @transform_11(%arg0: i32) -> (i32, i32, i32) {
    %c0_i32 = arith.constant 0 : i32
    %c0_i32_0 = arith.constant 0 : i32
    %c0_i32_1 = arith.constant 0 : i32
    return %arg0, %c0_i32, %c0_i32_0 : i32, i32, i32
  }
  func.func @transform_12(%arg0: i32) -> (i32, i32, i32) {
    %c0_i32 = arith.constant 0 : i32
    %c0_i32_0 = arith.constant 0 : i32
    %c0_i32_1 = arith.constant 0 : i32
    return %arg0, %c0_i32, %c0_i32_0 : i32, i32, i32
  }
  func.func @transform_13(%arg0: i32) -> (i32, i32) {
    %c0_i32 = arith.constant 0 : i32
    %c0_i32_0 = arith.constant 0 : i32
    %c0_i32_1 = arith.constant 0 : i32
    return %c0_i32, %c0_i32_0 : i32, i32
  }
  func.func @transform_14(%arg0: i32) -> (i32, i32) {
    %c0_i32 = arith.constant 0 : i32
    %c0_i32_0 = arith.constant 0 : i32
    %c0_i32_1 = arith.constant 0 : i32
    return %c0_i32, %c0_i32_0 : i32, i32
  }
  func.func @transform_15(%arg0: i32) -> (i32, i32) {
    %c0_i32 = arith.constant 0 : i32
    %c0_i32_0 = arith.constant 0 : i32
    %c0_i32_1 = arith.constant 0 : i32
    return %c0_i32, %c0_i32_0 : i32, i32
  }
  func.func @transform_16(%arg0: i32) -> (i32, i32, i32, i32) {
    %c0_i32 = arith.constant 0 : i32
    %c0_i32_0 = arith.constant 0 : i32
    %c0_i32_1 = arith.constant 0 : i32
    %c0_i32_2 = arith.constant 0 : i32
    return %arg0, %c0_i32, %c0_i32_0, %c0_i32_1 : i32, i32, i32, i32
  }
}

</mosaic_0001>

<bundles_post_ra>
// kernel: tpu_custom_call.1
= control target key start
LH: loop header
LB: loop body
LE: loop exit
PB: predicated region body
PF: predicated region fallthrough
CT: control target
= control target key end

     0   :  { %s3934_s0 = inlined_call_operand.hbm [shape: f32[16,32], index: 0, kind: input, shape index: {}]   ;;  %s3935_s1 = inlined_call_operand.vmem [shape: f32[2,32,96], index: 1, kind: input, shape index: {}]   ;;  %s3936_s2 = inlined_call_operand.vmem [shape: f32[2,1,96], index: 2, kind: input, shape index: {}]   ;;  %s3937_s3 = inlined_call_operand.vmem [shape: f32[2,32,32], index: 3, kind: input, shape index: {}]   ;;  %s3938_s4 = inlined_call_operand.vmem [shape: f32[2,1,32], index: 4, kind: input, shape index: {}]   ;;  %s3939_s5 = inlined_call_operand.vmem [shape: f32[2,32,64], index: 5, kind: input, shape index: {}]   ;;  %s3940_s6 = inlined_call_operand.vmem [shape: f32[2,1,64], index: 6, kind: input, shape index: {}]   ;;  %s3941_s7 = inlined_call_operand.vmem [shape: f32[2,64,32], index: 7, kind: input, shape index: {}]   ;;  %s3942_s8 = inlined_call_operand.vmem [shape: f32[2,1,32], index: 8, kind: input, shape index: {}]   ;;  %s3943_s9 = inlined_call_operand.vmem [shape: f32[2,1,32], index: 9, kind: input, shape index: {}]   ;;  %s3944_s10 = inlined_call_operand.vmem [shape: f32[2,1,32], index: 10, kind: input, shape index: {}]   ;;  %s3945_s11 = inlined_call_operand.vmem [shape: f32[2,1,32], index: 11, kind: input, shape index: {}]   ;;  %s3946_s12 = inlined_call_operand.vmem [shape: f32[2,1,32], index: 12, kind: input, shape index: {}]   ;;  %s3947_s13 = inlined_call_operand.vmem [shape: f32[1,32], index: 13, kind: input, shape index: {}]   ;;  %s3948_s14 = inlined_call_operand.vmem [shape: f32[1,32], index: 14, kind: input, shape index: {}]   ;;  %s3949_s15 = inlined_call_operand.hbm [shape: f32[16,32], index: 15, kind: output, shape index: {0}]   ;;  %s3950_s16 = inlined_call_operand.hbm [shape: f32[2,8,8,8], index: 16, kind: output, shape index: {1}]  }
   0x1   :  { %3963 = sst [smem:[#allocation22_spill]] %s3934_s0 }
   0x2   :  { %3964 = sst [smem:[#allocation23_spill]] %s3935_s1 }
   0x3   :  { %3965 = sst [smem:[#allocation24_spill]] %s3937_s3 }
   0x4   :  { %3966 = sst [smem:[#allocation25_spill]] %s3939_s5 }
   0x5   :  { %3967 = sst [smem:[#allocation26_spill]] %s3940_s6 }
   0x6   :  { %3968 = sst [smem:[#allocation27_spill]] %s3947_s13 }
   0x7   :  { %3969 = sst [smem:[#allocation28_spill]] %s3948_s14 }
   0x8   :  { %3970 = sst [smem:[#allocation29_spill]] %s3949_s15 }
   0x9   :  { %3971 = sst [smem:[#allocation30_spill]] %s3950_s16 }
   0xa   :  { %22 = vsyncpa [#allocation6], 0 }
   0xb   :  { %23 = vsyncpa [#allocation7], 0 }
   0xc   :  { %24 = vsyncpa [#allocation10], 0 }
   0xd   :  { %26 = vsyncpa [#allocation10 + $0x1], 0  ;;  %s3473_s21 = smov 0   ;;  %s3475_s22 = smov 0  }
   0xe   :  { %s3477_s23 = smov 0   ;;  %s3479_s24 = smov 0  }
   0xf LB: > { %3972 = sst [smem:[#allocation14_spill]] %s3352_s21  ;;  %s3494_s25 = sadd.s32 4294967295, %s3364_s24   ;;  %s3364_s24 = sphi %s3479_s24, %s4008_s24   ;;  %s3360_s23 = sphi %s3477_s23, %s4011_s23   ;;  %s3356_s22 = sphi %s3475_s22, %s4010_s22   ;;  %s3352_s21 = sphi %s3473_s21, %s4009_s21  }
  0x10   : > { %3973 = sst [smem:[#allocation15_spill]] %s3356_s22  ;;  %s2856_s26 = sadd.s32 4294967294, %s3364_s24  }
  0x11   : > { %3974 = sst [smem:[#allocation16_spill]] %s3360_s23  ;;  %s3498_s27 = sadd.s32 1, %s3364_s24  }
  0x12   : > { %3975 = sst [smem:[#allocation17_spill]] %s3364_s24  ;;  %s435_s28 = sadd.s32 1, %s3360_s23 }
  0x13   : > { %3976 = sst [smem:[#allocation18_spill]] %s3498_s27  ;;  %s432_s29 = ssub.s32 %s3364_s24, %s3498_s27 }
  0x14   : > { %p445_p0 = scmp.ne.s32.totalorder %s3360_s23, %s3356_s22  ;;  %p433_p1 = scmp.eq.s32.totalorder %s432_s29, 0 }
  0x15   : > { %p3951_p2 = scmp.eq.s32.totalorder %s3494_s25, 1  ;;  %p451_p3 = scmp.ne.s32.totalorder %s3356_s22, %s3352_s21 }
  0x16   : > { %p452_p4 = scmp.eq.s32.totalorder %s2856_s26, 1  ;;  %p2857_p7 = scmp.ge.s32.totalorder %s3364_s24, 1 }
  0x17   : > { %s3509_s30 = scalar_select %p433_p1, %s3360_s23, %s435_s28  }
  0x18   : > { %p3513_p5 = por %p3951_p2, %p445_p0  ;;  %p3517_p6 = por %p452_p4, %p451_p3 }
  0x19   : > { %3977 = sst [smem:[#allocation19_spill]] %s3509_s30  ;;  %p459_p8 = scmp.lt.s32.totalorder %s3364_s24, 3 }
  0x1a   : > { %s3978_s0 = scalar_select %p3513_p5, 1, 0 }
  0x1b   : > { %s3980_s17 = scalar_select %p3517_p6, 1, 0 }
  0x1c   : > { %3979 = sst [smem:[#allocation20_spill]] %s3978_s0  ;;  %p3144_p10 = scmp.eq.s32.totalorder %s3494_s25, 0 }
  0x1d   : > { %3981 = sst [smem:[#allocation21_spill]] %s3980_s17  ;;  %p3525_p11 = pnand %p2857_p7, %p459_p8 }
  0x1e   : > { %s3366_s19 = smov [#allocation5]  }
  0x1f   : > { %s471_s20 = sshll.u32 %s3366_s19, 4  ;;  %p3136_p12 = pneg %p3525_p11  ;;  %s472_s20 = int_to_ptr.vmem [resolvable:$true] %s471_s20 }
  0x20   : > { %s3257_s26 = scalar_lea.vmem %s472_s20, 256  ;;  %p3265_p2 = scmp.lt.s32.totalorder %s472_s20, %s472_s20 }
  0x21   : > { %p3137_p13 = pnand %p3144_p10, %p3136_p12  ;;  %p3258_p1 = scmp.ne.s32.totalorder %s472_s20, %s3257_s26 }
  0x22   : > { %p3266_p9 = scmp.lt.s32.totalorder %s3257_s26, %s3257_s26 }
  0x23   : > { %p3248_p0 = pneg %p3137_p13 }
  0x24   : > { %p3267_p6 = por %p3266_p9, %p3265_p2 }
  0x25   : > { %p3260_p3 = pnand %p3258_p1, %p3248_p0 }
  0x27   : > { %p3261_p4 = pneg %p3260_p3 }
  0x29   : > { %p3268_p7 = pnand %p3267_p6, %p3261_p4 }
  0x2b   : > { %3271 = shalt.err (!%p3268_p7)
}
  0x2c   : > { %s3367_s28 = smov 128   ;;  %s3368_s29 = smov 8  }
  0x2d   : > { %s3983_s19 = sld [smem:[#allocation22_spill]] }
  0x2f   : > { %573 = sbr.rel (%p3525_p11) target bundleno = 2877 (0xb3d), region = 80 }
  0x33   : > { %3139 = dma.hbm_to_vmem [thread:$0]  (!%p3137_p13), %s3983_s19, 256, %s472_s20, [#allocation6], %s3367_s28, %s3367_s28, %s3368_s29  }
  0x34   : > { %3339 = dma.done.wait (%p3144_p10), [#allocation6], 256  }
  0x35   : > { %3341 = vsyncadd (%p3144_p10), [#allocation6], 4294967040  ;;  %s3956_s26 = sand.u32 1, %s3356_s22   ;;  %p662_p2 = scmp.lt.s32.totalorder %s3494_s25, 1 }
  0x36   : > { %s2862_s27 = sshll.u32 %s3956_s26, 6  ;;  %s3984_s1 = sld [smem:[#allocation23_spill]] }
  0x37   : > { %s3547_s17 = scalar_select %p662_p2, %s3494_s25, 1 }
  0x38   : > { %s3985_s3 = sld [smem:[#allocation24_spill]]  ;;  %s3601_s29 = scalar_lea.vmem [#allocation9], %s2862_s27 }
  0x39   : > { %s2929_s23 = sshll.u32 %s3547_s17, 5  ;;  %s3986_s5 = sld [smem:[#allocation25_spill]] }
  0x3a   : > { %s2932_s28 = sshll.u32 %s3547_s17, 6  ;;  %s693_s16 = scalar_lea.vmem %s3942_s8, %s3547_s17 }
  0x3b   : > { %s3579_s21 = scalar_lea.vmem %s3941_s7, %s2932_s28  ;;  %s696_s14 = scalar_lea.vmem %s3943_s9, %s3547_s17 }
  0x3c   : > { %s666_s19 = scalar_lea.vmem %s3984_s1, %s2929_s23  ;;  %s702_s20 = scalar_lea.vmem %s3945_s11, %s3547_s17 }
  0x3d   : > { %s705_s28 = scalar_lea.vmem %s3946_s12, %s3547_s17  ;;  %p3988_p6 = scmp.ne.s32.totalorder %s3494_s25, 0 }
  0x3e   : > { %s3560_s24 = scalar_lea.vmem %s3985_s3, %s2929_s23 }
  0x3f   : > { %s3569_s13 = scalar_lea.vmem %s3986_s5, %s2929_s23  ;;  %s699_s5 = scalar_lea.vmem %s3944_s10, %s3547_s17 }
  0x40   : > { %709 = sbr.rel (%p3988_p6) target bundleno = 71 (0x47), region = 88 }
  0x45   : > { %v710_v0 = vld [vmem:[#allocation5] sm:$0xff]  ;;  %vm712_vm0 = vcmask 261120   ;;  %v711_v1 = vld [vmem:[#allocation5 + $0x8] sm:$0xff] }
  0x46   : > { %713 = vst.msk [vmem:[#allocation2] sm:$0xff] %vm712_vm0, %v710_v0  ;;  %714 = vst.msk [vmem:[#allocation2 + $0x8] sm:$0xff] %vm712_vm0, %v711_v1 }
  0x47 PF: > { %v720_v2 = vld [vmem:[%s666_s19 + $0x18] sm:$0xff]  ;;  %v719_v3 = vld [vmem:[%s666_s19 + $0x10] sm:$0xff]  ;;  %vm728_vm1 = vcmask 261120   ;;  %v718_v5 = vld [vmem:[%s666_s19 + $0x8] sm:$0xff]  ;;  %v3369_v8 = vmov 0.0   ;;  %s3989_s22 = scalar_lea.vmem %s3936_s2, %s3547_s17  ;;  %vm810_vm2 = vcmask 785408  }
  0x48   : > { %2994 = vmatprep.subr.mxu1 %v720_v2  ;;  %v717_v6 = vld [vmem:[%s666_s19] sm:$0xff]  ;;  %3015 = vmatprep.subr.mxu0 %v3369_v8  ;;  %vm3370_vm3 = vmmov 0   ;;  %s3371_s27 = smov 120   ;;  %s3372_s19 = smov 96   ;;  %vm817_vm4 = vcmask 64512   ;;  %vm1156_vm5 = vcmask 130112  }
  0x49   : > { %2995 = vmatpush3.msra.mxu1 %v720_v2  ;;  %v2872_v9 = vld [vmem:[%s3989_s22] ss:$0 sm:$0xff]  ;;  %3017 = vmatprep.mubr.msk.f32.mxu0 %vm3370_vm3, %v3369_v8  ;;  %s3373_s26 = smov 80   ;;  %s3374_s0 = smov 88   ;;  %vm1332_vm6 = vcmask 195712   ;;  %vm1508_vm7 = vcmask 261312  }
  0x4a   : > { %2996 = vmatprep.subr.mxu1 %v719_v3  ;;  %s3375_s15 = smov 72   ;;  %s3376_s23 = smov 112   ;;  %vm2454_vm8 = vcmask 523264  }
  0x4b   : > { %2997 = vmatpush3.msra.mxu1 %v719_v3  ;;  %s3377_s30 = smov 104   ;;  %s3378_s18 = smov 56  }
  0x4c   : > { %2998 = vmatprep.subr.mxu1 %v718_v5  ;;  %s3379_s1 = smov 64   ;;  %s3380_s3 = smov 40  }
  0x4d   : > { %v3605_v4 = vld [vmem:[#allocation2] sm:$0xff]  ;;  %2999 = vmatpush3.msra.mxu1 %v718_v5  ;;  %v3609_v7 = vld [vmem:[#allocation2 + $0x8] sm:$0xff]  ;;  %s3381_s6 = smov 48   ;;  %s3382_s22 = smov 8  }
  0x4e   : > { %3002 = vmatprep.mubr.msk.f32.mxu1 %vm728_vm1, %v3605_v4  ;;  %3000 = vmatprep.subr.mxu1 %v717_v6  ;;  %p2919_p8 = scmp.ne.s32.totalorder %s3494_s25, 1 }
  0x4f   : > { %3001 = vmatpush3.msra.mxu1 %v717_v6 }
  0x50   : > { %3003 = vmatmul.mubr.msk.f32.vlgmr.msra.gmra.mxu1 %vm728_vm1, %v3609_v7  ;;  %3005 = vmatprep.subr.mxu1 %v3369_v8 }
  0x51   : > { %3007 = vmatprep.mubr.msk.f32.mxu1 %vm3370_vm3, %v3369_v8 }
 0x110   : > { %v3004_v10 = vpop.f32.mrf.mxu1 }
 0x111   : > { %v807_v11 = vadd.f32 %v3004_v10, %v2872_v9 }
 0x112   : > { %v801_v12 = vpop.f32.mrf.mxu1 }
 0x113   : > { %812 = vst.msk [vmem:[#allocation3 + $0x8] sm:$0xff] %vm810_vm2, %v807_v11  ;;  %v802_v13 = vadd.f32 %v2872_v9, %v801_v12 }
 0x115   : > { %811 = vst.msk [vmem:[#allocation3] sm:$0xff] %vm810_vm2, %v802_v13 }
 0x11a   : > { %v3632_v15 = vld [vmem:[#allocation3 + $0x8] sm:$0xff] }
 0x11c   : > { %v3624_v14 = vld [vmem:[#allocation3] sm:$0xff] }
 0x11d   : > { %984 = vrot.lane.b32.xlu1 %v3624_v14, %s3371_s27  ;;  %815 = vrot.lane.b32.xlu0 %v3624_v14, %s3372_s19 }
 0x121   : > { %1162 = vrot.lane.b32.xlu1 %v3624_v14, %s3373_s26  ;;  %986 = vrot.lane.b32.xlu0 %v3624_v14, %s3374_s0 }
 0x125   : > { %1338 = vrot.lane.b32.xlu1 %v3624_v14, %s3375_s15  ;;  %1160 = vrot.lane.b32.xlu0 %v3624_v14, %s3376_s23 }
 0x129   : > { %1512 = vrot.lane.b32.xlu1 %v3632_v15, %s3372_s19  ;;  %1336 = vrot.lane.b32.xlu0 %v3624_v14, %s3377_s30  ;;  %s3384_s19 = smov 24  }
 0x12d   : > { %1681 = vrot.lane.b32.xlu1 %v3632_v15, %s3371_s27  ;;  %1683 = vrot.lane.b32.xlu0 %v3632_v15, %s3374_s0  ;;  %s3383_s27 = smov 16   ;;  %s3990_s0 = scalar_lea.vmem %s3938_s4, %s3547_s17 }
 0x131   : > { %1856 = vrot.lane.b32.xlu1 %v3632_v15, %s3376_s23  ;;  %1858 = vrot.lane.b32.xlu0 %v3632_v15, %s3373_s26 }
 0x135   : > { %2031 = vrot.lane.b32.xlu1 %v3632_v15, %s3377_s30  ;;  %2033 = vrot.lane.b32.xlu0 %v3632_v15, %s3375_s15 }
 0x139   : > { %1076 = vrot.lane.b32.xlu1 %v3624_v14, %s3378_s18  ;;  %905 = vrot.lane.b32.xlu0 %v3624_v14, %s3379_s1 }
 0x18f   : > { %v985_v16 = vpop.permute.xlu1 %984  ;;  %v816_v17 = vpop.permute.xlu0 %815 }
 0x190   : > { %3006 = vmatpush3.xpose.msk.msra.mxu1 %vm817_vm4, %v816_v17 }
 0x191   : > { %3010 = vmatprep.subr.mxu1 %v3369_v8 }
 0x193   : > { %v1163_v18 = vpop.permute.xlu1 %1162  ;;  %3008 = vmatmul.mubr.msk.f32.vlgmr.msra.gmra.mxu1 %vm817_vm4, %v3624_v14  ;;  %v987_v19 = vpop.permute.xlu0 %986 }
 0x194   : > { %3016 = vmatpush3.xpose.msk.msra.mxu0 %vm817_vm4, %v987_v19  ;;  %3012 = vmatprep.mubr.msk.f32.mxu1 %vm3370_vm3, %v3369_v8 }
 0x195   : > { %3025 = vmatprep.subr.mxu0 %v3369_v8 }
 0x197   : > { %v1339_v20 = vpop.permute.xlu1 %1338  ;;  %3018 = vmatmul.mubr.msk.f32.vlgmr.msra.gmra.mxu0 %vm817_vm4, %v985_v16  ;;  %v1161_v21 = vpop.permute.xlu0 %1160 }
 0x198   : > { %3026 = vmatpush3.xpose.msk.msra.mxu0 %vm817_vm4, %v1163_v18  ;;  %3027 = vmatprep.mubr.msk.f32.mxu0 %vm3370_vm3, %v3369_v8 }
 0x199   : > { %3035 = vmatprep.subr.mxu0 %v3369_v8 }
 0x19b   : > { %3028 = vmatmul.mubr.msk.f32.vlgmr.msra.gmra.mxu0 %vm817_vm4, %v1161_v21  ;;  %v1337_v22 = vpop.permute.xlu0 %1336  ;;  %v1513_v23 = vpop.permute.xlu1 %1512 }
 0x19c   : > { %3036 = vmatpush3.xpose.msk.msra.mxu0 %vm817_vm4, %v1339_v20  ;;  %3037 = vmatprep.mubr.msk.f32.mxu0 %vm3370_vm3, %v3369_v8 }
 0x19d   : > { %3045 = vmatprep.subr.mxu0 %v3369_v8 }
 0x19f   : > { %3038 = vmatmul.mubr.msk.f32.vlgmr.msra.gmra.mxu0 %vm817_vm4, %v1337_v22  ;;  %v1684_v24 = vpop.permute.xlu0 %1683  ;;  %v1682_v25 = vpop.permute.xlu1 %1681 }
 0x1a0   : > { %3046 = vmatpush3.xpose.msk.msra.mxu0 %vm817_vm4, %v1513_v23  ;;  %3047 = vmatprep.mubr.msk.f32.mxu0 %vm3370_vm3, %v3369_v8 }
 0x1a1   : > { %3055 = vmatprep.subr.mxu0 %v3369_v8 }
 0x1a3   : > { %3048 = vmatmul.mubr.msk.f32.vlgmr.msra.gmra.mxu0 %vm817_vm4, %v3632_v15  ;;  %v1859_v26 = vpop.permute.xlu0 %1858  ;;  %v1857_v28 = vpop.permute.xlu1 %1856 }
 0x1a4   : > { %3056 = vmatpush3.xpose.msk.msra.mxu0 %vm817_vm4, %v1684_v24  ;;  %3057 = vmatprep.mubr.msk.f32.mxu0 %vm3370_vm3, %v3369_v8 }
 0x1a5   : > { %3065 = vmatprep.subr.mxu0 %v3369_v8 }
 0x1a7   : > { %3058 = vmatmul.mubr.msk.f32.vlgmr.msra.gmra.mxu0 %vm817_vm4, %v1682_v25  ;;  %v2034_v27 = vpop.permute.xlu0 %2033  ;;  %v2032_v30 = vpop.permute.xlu1 %2031 }
 0x1a8   : > { %3066 = vmatpush3.xpose.msk.msra.mxu0 %vm817_vm4, %v1859_v26  ;;  %3067 = vmatprep.mubr.msk.f32.mxu0 %vm3370_vm3, %v3369_v8 }
 0x1a9   : > { %3075 = vmatprep.subr.mxu0 %v3369_v8 }
 0x1ab   : > { %3068 = vmatmul.mubr.msk.f32.vlgmr.msra.gmra.mxu0 %vm817_vm4, %v1857_v28  ;;  %v906_v29 = vpop.permute.xlu0 %905  ;;  %v3698_v63 = vpop.permute.xlu1 %1076 }
 0x1ac   : > { %3011 = vmatpush3.msra.mxu1 %v906_v29  ;;  %3076 = vmatpush3.xpose.msk.msra.mxu0 %vm817_vm4, %v2034_v27 }
 0x1ad   : > { %3077 = vmatprep.mubr.msk.f32.mxu0 %vm3370_vm3, %v3369_v8  ;;  %3020 = vmatprep.subr.mxu1 %v3369_v8 }
 0x1af   : > { %3078 = vmatmul.mubr.msk.f32.vlgmr.msra.gmra.mxu0 %vm817_vm4, %v2032_v30 }
 0x253   : > { %v888_v31 = vpop.f32.mrf.mxu1 }
 0x254   : > { %v892_v32 = vmul.f32 0.35355338, %v888_v31 }
 0x255   : > { %v3009_v33 = vpop.f32.mrf.mxu1 }
 0x256   : > { %v893_v34 = vsel %vm817_vm4, %v892_v32, -inf }
 0x257   : > { %894 = vmax.xlane.f32.xlu0 %v893_v34  ;;  %v1058_v35 = vpop.f32.mrf.mxu0 }
 0x258   : > { %v1062_v36 = vmul.f32 0.35355338, %v1058_v35 }
 0x259   : > { %v3019_v37 = vpop.f32.mrf.mxu0 }
 0x25a   : > { %v1063_v38 = vsel %vm817_vm4, %v1062_v36, -inf }
 0x25b   : > { %1064 = vmax.xlane.f32.xlu1 %v1063_v38  ;;  %v1234_v39 = vpop.f32.mrf.mxu0 }
 0x25c   : > { %v1238_v40 = vmul.f32 0.35355338, %v1234_v39 }
 0x25d   : > { %v3029_v41 = vpop.f32.mrf.mxu0 }
 0x25e   : > { %v1239_v42 = vsel %vm817_vm4, %v1238_v40, -inf }
 0x25f   : > { %1240 = vmax.xlane.f32.xlu0 %v1239_v42  ;;  %v1410_v43 = vpop.f32.mrf.mxu0 }
 0x260   : > { %v1414_v44 = vmul.f32 0.35355338, %v1410_v43 }
 0x261   : > { %v3039_v45 = vpop.f32.mrf.mxu0 }
 0x262   : > { %v1415_v46 = vsel %vm817_vm4, %v1414_v44, -inf }
 0x263   : > { %1416 = vmax.xlane.f32.xlu0 %v1415_v46  ;;  %v1584_v47 = vpop.f32.mrf.mxu0 }
 0x264   : > { %v1588_v48 = vmul.f32 0.35355338, %v1584_v47 }
 0x265   : > { %v3049_v49 = vpop.f32.mrf.mxu0 }
 0x266   : > { %v1589_v50 = vsel %vm817_vm4, %v1588_v48, -inf }
 0x267   : > { %1590 = vmax.xlane.f32.xlu1 %v1589_v50  ;;  %v1755_v51 = vpop.f32.mrf.mxu0 }
 0x268   : > { %v1759_v52 = vmul.f32 0.35355338, %v1755_v51 }
 0x269   : > { %v3059_v53 = vpop.f32.mrf.mxu0 }
 0x26a   : > { %v1760_v54 = vsel %vm817_vm4, %v1759_v52, -inf }
 0x26b   : > { %1761 = vmax.xlane.f32.xlu0 %v1760_v54  ;;  %v1930_v55 = vpop.f32.mrf.mxu0 }
 0x26c   : > { %v1934_v56 = vmul.f32 0.35355338, %v1930_v55 }
 0x26d   : > { %v3069_v57 = vpop.f32.mrf.mxu0 }
 0x26e   : > { %v1935_v58 = vsel %vm817_vm4, %v1934_v56, -inf }
 0x26f   : > { %1936 = vmax.xlane.f32.xlu1 %v1935_v58  ;;  %v2105_v59 = vpop.f32.mrf.mxu0 }
 0x270   : > { %v2109_v60 = vmul.f32 0.35355338, %v2105_v59 }
 0x271   : > { %v3079_v61 = vpop.f32.mrf.mxu0 }
 0x272   : > { %v2110_v62 = vsel %vm817_vm4, %v2109_v60, -inf }
 0x273   : > { %2111 = vmax.xlane.f32.xlu0 %v2110_v62 }
 0x280   : > { %1428 = vrot.lane.b32.xlu1 %v3624_v14, %s3380_s3 }
 0x289   : > { %1252 = vrot.lane.b32.xlu0 %v3624_v14, %s3381_s6 }
 0x2e0   : > { %v895_v0 = vpop.xlane.xlu0 %894 }
 0x2e1   : > { %v896_v1 = vsub.f32 %v892_v32, %v895_v0 }
 0x2e3   : > { %v897_v2 = vmul.f32 1.442695, %v896_v1 }
 0x2e4   : > { %v1065_v3 = vpop.xlane.xlu1 %1064 }
 0x2e5   : > { %3202 = vpow2.f32 %v897_v2  ;;  %v1066_v5 = vsub.f32 %v1062_v36, %v1065_v3 }
 0x2e7   : > { %v1067_v6 = vmul.f32 1.442695, %v1066_v5 }
 0x2e8   : > { %v1241_v9 = vpop.xlane.xlu0 %1240 }
 0x2e9   : > { %3204 = vpow2.f32 %v1067_v6  ;;  %v1242_v10 = vsub.f32 %v1238_v40, %v1241_v9 }
 0x2eb   : > { %v1243_v11 = vmul.f32 1.442695, %v1242_v10 }
 0x2ec   : > { %v1417_v12 = vpop.xlane.xlu0 %1416 }
 0x2ed   : > { %3206 = vpow2.f32 %v1243_v11  ;;  %v1418_v13 = vsub.f32 %v1414_v44, %v1417_v12 }
 0x2ef   : > { %v1419_v16 = vmul.f32 1.442695, %v1418_v13 }
 0x2f0   : > { %v1591_v24 = vpop.xlane.xlu1 %1590 }
 0x2f1   : > { %3208 = vpow2.f32 %v1419_v16  ;;  %v1592_v25 = vsub.f32 %v1588_v48, %v1591_v24  ;;  %v2207_v24 = vld [vmem:[%s3560_s24 + $0x8] sm:$0xff] }
 0x2f2   : > { %v3203_v17 = vpop.eup %3202 }
 0x2f3   : > { %v899_v14 = vsel %vm817_vm4, %v3203_v17, 0.0  ;;  %v1593_v29 = vmul.f32 1.442695, %v1592_v25 }
 0x2f4   : > { %900 = vadd.xlane.f32.xlu1 %v899_v14  ;;  %v1762_v26 = vpop.xlane.xlu0 %1761 }
 0x2f5   : > { %v1763_v28 = vsub.f32 %v1759_v52, %v1762_v26  ;;  %3210 = vpow2.f32 %v1593_v29  ;;  %v2206_v26 = vld [vmem:[%s3560_s24] sm:$0xff] }
 0x2f6   : > { %v3205_v18 = vpop.eup %3204 }
 0x2f7   : > { %v1069_v19 = vsel %vm817_vm4, %v3205_v18, 0.0  ;;  %v1764_v32 = vmul.f32 1.442695, %v1763_v28 }
 0x2f8   : > { %1070 = vadd.xlane.f32.xlu0 %v1069_v19  ;;  %v1937_v27 = vpop.xlane.xlu1 %1936 }
 0x2f9   : > { %v1938_v30 = vsub.f32 %v1934_v56, %v1937_v27  ;;  %3212 = vpow2.f32 %v1764_v32 }
 0x2fa   : > { %v3702_v20 = vpop.eup %3206 }
 0x2fb   : > { %v1245_v21 = vsel %vm817_vm4, %v3702_v20, 0.0  ;;  %v1939_v33 = vmul.f32 1.442695, %v1938_v30 }
 0x2fc   : > { %1246 = vadd.xlane.f32.xlu1 %v1245_v21  ;;  %v2112_v31 = vpop.xlane.xlu0 %2111  ;;  %v1429_v44 = vpop.permute.xlu1 %1428  ;;  %v2209_v21 = vld [vmem:[%s3560_s24 + $0x18] sm:$0xff] }
 0x2fd   : > { %v2113_v34 = vsub.f32 %v2109_v60, %v2112_v31  ;;  %3214 = vpow2.f32 %v1939_v33  ;;  %3085 = vmatprep.subr.mxu0 %v2209_v21 }
 0x2fe   : > { %v3706_v22 = vpop.eup %3208  ;;  %3086 = vmatpush3.msra.mxu0 %v2209_v21  ;;  %v2440_v21 = vld [vmem:[%s3579_s21 + $0x8] sm:$0xff] }
 0x2ff   : > { %v1421_v23 = vsel %vm817_vm4, %v3706_v22, 0.0  ;;  %v2114_v35 = vmul.f32 1.442695, %v2113_v34 }
 0x300   : > { %1422 = vadd.xlane.f32.xlu0 %v1421_v23  ;;  %v1253_v45 = vpop.permute.xlu0 %1252 }
 0x301   : > { %3216 = vpow2.f32 %v2114_v35 }
 0x302   : > { %v3714_v36 = vpop.eup %3210 }
 0x303   : > { %v1595_v38 = vsel %vm817_vm4, %v3714_v36, 0.0 }
 0x306   : > { %v3716_v37 = vpop.eup %3212 }
 0x307   : > { %v1766_v41 = vsel %vm817_vm4, %v3716_v37, 0.0 }
 0x30a   : > { %v3720_v39 = vpop.eup %3214 }
 0x30b   : > { %v1941_v40 = vsel %vm817_vm4, %v3720_v39, 0.0 }
 0x30d   : > { %1773 = vrot.lane.b32.xlu1 %v3632_v15, %s3378_s18  ;;  %s3991_s18 = sld [smem:[#allocation26_spill]] }
 0x30e   : > { %v3726_v42 = vpop.eup %3216 }
 0x30f   : > { %v2116_v43 = vsel %vm817_vm4, %v3726_v42, 0.0 }
 0x316   : > { %1602 = vrot.lane.b32.xlu0 %v3632_v15, %s3379_s1  ;;  %s3992_s1 = scalar_lea.vmem %s3991_s18, %s3547_s17 }
 0x331   : > { %1596 = vadd.xlane.f32.xlu1 %v1595_v38 }
 0x335   : > { %1942 = vadd.xlane.f32.xlu1 %v1941_v40  ;;  %1767 = vadd.xlane.f32.xlu0 %v1766_v41  ;;  %v2906_v40 = vld [vmem:[%s3990_s0] ss:$0 sm:$0xff]  ;;  %s3994_s0 = sld [smem:[#allocation28_spill]] (!%p2919_p8) }
 0x339   : > { %2117 = vadd.xlane.f32.xlu1 %v2116_v43 }
 0x34a   : > { %2123 = vrot.lane.b32.xlu1 %v3632_v15, %s3380_s3 }
 0x34b   : > { %1948 = vrot.lane.b32.xlu0 %v3632_v15, %s3381_s6 }
 0x37d   : > { %v901_v46 = vpop.xlane.xlu1 %900 }
 0x37e   : > { %3218 = vrcp.f32 %v901_v46 }
 0x381   : > { %v1071_v47 = vpop.xlane.xlu0 %1070 }
 0x382   : > { %3220 = vrcp.f32 %v1071_v47 }
 0x385   : > { %v1247_v48 = vpop.xlane.xlu1 %1246 }
 0x386   : > { %3222 = vrcp.f32 %v1247_v48 }
 0x389   : > { %v1423_v49 = vpop.xlane.xlu0 %1422  ;;  %v1774_v58 = vpop.permute.xlu1 %1773 }
 0x38a   : > { %3224 = vrcp.f32 %v1423_v49 }
 0x38b   : > { %v3219_v50 = vpop.eup %3218 }
 0x38c   : > { %v903_v51 = vmul.f32 %v3219_v50, %v3203_v17 }
 0x38d   : > { %v1603_v57 = vpop.permute.xlu0 %1602 }
 0x38e   : > { %904 = vst.msk [vmem:[%s3601_s29] sm:$0xff] %vm817_vm4, %v903_v51  ;;  %3013 = vmatmul.mubr.msk.f32.vlgmr.msra.gmra.mxu1 %vm817_vm4, %v903_v51 }
 0x38f   : > { %v3221_v52 = vpop.eup %3220  ;;  %3021 = vmatpush3.msra.mxu1 %v3698_v63  ;;  %3022 = vmatprep.mubr.msk.f32.mxu1 %vm3370_vm3, %v3369_v8 }
 0x390   : > { %3030 = vmatprep.subr.mxu1 %v3369_v8  ;;  %v1073_v15 = vmul.f32 %v3221_v52, %v3205_v18 }
 0x392   : > { %2880 = vst.msk [vmem:[%s3601_s29 + $0x8] sm:$0xff] %vm817_vm4, %v1073_v15  ;;  %3023 = vmatmul.mubr.msk.f32.vlgmr.msra.gmra.mxu1 %vm817_vm4, %v1073_v15 }
 0x393   : > { %v3223_v53 = vpop.eup %3222  ;;  %3031 = vmatpush3.msra.mxu1 %v1253_v45  ;;  %3032 = vmatprep.mubr.msk.f32.mxu1 %vm3370_vm3, %v3369_v8 }
 0x394   : > { %3040 = vmatprep.subr.mxu1 %v3369_v8  ;;  %v1249_v54 = vmul.f32 %v3223_v53, %v3702_v20 }
 0x396   : > { %2884 = vst.msk [vmem:[%s3601_s29 + $0x10] sm:$0xff] %vm817_vm4, %v1249_v54  ;;  %3033 = vmatmul.mubr.msk.f32.vlgmr.msra.gmra.mxu1 %vm817_vm4, %v1249_v54 }
 0x397   : > { %v3225_v55 = vpop.eup %3224  ;;  %3041 = vmatpush3.msra.mxu1 %v1429_v44  ;;  %3042 = vmatprep.mubr.msk.f32.mxu1 %vm3370_vm3, %v3369_v8 }
 0x398   : > { %3050 = vmatprep.subr.mxu1 %v3369_v8  ;;  %v1425_v56 = vmul.f32 %v3225_v55, %v3706_v22  ;;  %v2208_v22 = vld [vmem:[%s3560_s24 + $0x10] sm:$0xff] }
 0x399   : > { %3087 = vmatprep.subr.mxu0 %v2208_v22 }
 0x39a   : > { %2888 = vst.msk [vmem:[%s3601_s29 + $0x18] sm:$0xff] %vm817_vm4, %v1425_v56  ;;  %3043 = vmatmul.mubr.msk.f32.vlgmr.msra.gmra.mxu1 %vm817_vm4, %v1425_v56  ;;  %3088 = vmatpush3.msra.mxu0 %v2208_v22  ;;  %v2348_v56 = vld [vmem:[%s3569_s13 + $0x18] sm:$0xff]  ;;  %v2439_v22 = vld [vmem:[%s3579_s21] sm:$0xff] }
 0x39b   : > { %3051 = vmatpush3.msra.mxu1 %v1603_v57  ;;  %3052 = vmatprep.mubr.msk.f32.mxu1 %vm3370_vm3, %v3369_v8  ;;  %v2347_v57 = vld [vmem:[%s3569_s13 + $0x10] sm:$0xff] }
 0x39c   : > { %3060 = vmatprep.subr.mxu1 %v3369_v8  ;;  %3089 = vmatprep.subr.mxu0 %v2207_v24 }
 0x39d   : > { %3090 = vmatpush3.msra.mxu0 %v2207_v24 }
 0x39e   : > { %3091 = vmatprep.subr.mxu0 %v2206_v26 }
 0x39f   : > { %3092 = vmatpush3.msra.mxu0 %v2206_v26 }
 0x3ba   : > { %v1597_v59 = vpop.xlane.xlu1 %1596 }
 0x3bb   : > { %3226 = vrcp.f32 %v1597_v59  ;;  %v2345_v59 = vld [vmem:[%s3569_s13] sm:$0xff] }
 0x3be   : > { %v1943_v60 = vpop.xlane.xlu1 %1942  ;;  %v1768_v61 = vpop.xlane.xlu0 %1767 }
 0x3bf   : > { %3228 = vrcp.f32 %v1943_v60  ;;  %v2446_v60 = vld [vmem:[%s3579_s21 + $0x38] sm:$0xff] }
 0x3c0   : > { %3230 = vrcp.f32 %v1768_v61  ;;  %v2445_v61 = vld [vmem:[%s3579_s21 + $0x30] sm:$0xff]  ;;  %3107 = vmatprep.subr.mxu0 %v2446_v60 }
 0x3c2   : > { %v2118_v62 = vpop.xlane.xlu1 %2117  ;;  %v1949_v9 = vpop.permute.xlu0 %1948 }
 0x3c3   : > { %3232 = vrcp.f32 %v2118_v62  ;;  %v2444_v62 = vld [vmem:[%s3579_s21 + $0x28] sm:$0xff] }
 0x3c6   : > { %v2124_v11 = vpop.permute.xlu1 %2123 }
 0x3c8   : > { %v3227_v63 = vpop.eup %3226 }
 0x3c9   : > { %v1599_v0 = vmul.f32 %v3227_v63, %v3714_v36  ;;  %v2443_v63 = vld [vmem:[%s3579_s21 + $0x20] sm:$0xff] }
 0x3cb   : > { %2892 = vst.msk [vmem:[%s3601_s29 + $0x20] sm:$0xff] %vm817_vm4, %v1599_v0  ;;  %3053 = vmatmul.mubr.msk.f32.vlgmr.msra.gmra.mxu1 %vm817_vm4, %v1599_v0 }
 0x3cc   : > { %v3229_v1 = vpop.eup %3228  ;;  %3061 = vmatpush3.msra.mxu1 %v1774_v58  ;;  %3062 = vmatprep.mubr.msk.f32.mxu1 %vm3370_vm3, %v3369_v8  ;;  %v2346_v58 = vld [vmem:[%s3569_s13 + $0x8] sm:$0xff] }
 0x3cd   : > { %v3231_v2 = vpop.eup %3230  ;;  %3070 = vmatprep.subr.mxu1 %v3369_v8  ;;  %v1945_v3 = vmul.f32 %v3229_v1, %v3720_v39 }
 0x3ce   : > { %v1770_v5 = vmul.f32 %v3231_v2, %v3716_v37 }
 0x3cf   : > { %2900 = vst.msk [vmem:[%s3601_s29 + $0x30] sm:$0xff] %vm817_vm4, %v1945_v3 }
 0x3d0   : > { %v3233_v6 = vpop.eup %3232  ;;  %2896 = vst.msk [vmem:[%s3601_s29 + $0x28] sm:$0xff] %vm817_vm4, %v1770_v5  ;;  %3063 = vmatmul.mubr.msk.f32.vlgmr.msra.gmra.mxu1 %vm817_vm4, %v1770_v5 }
 0x3d1   : > { %3071 = vmatpush3.msra.mxu1 %v1949_v9  ;;  %3072 = vmatprep.mubr.msk.f32.mxu1 %vm3370_vm3, %v3369_v8  ;;  %v2120_v10 = vmul.f32 %v3233_v6, %v3726_v42 }
 0x3d2   : > { %3080 = vmatprep.subr.mxu1 %v3369_v8 }
 0x3d3   : > { %2904 = vst.msk [vmem:[%s3601_s29 + $0x38] sm:$0xff] %vm817_vm4, %v2120_v10 }
 0x3d4   : > { %3073 = vmatmul.mubr.msk.f32.vlgmr.msra.gmra.mxu1 %vm817_vm4, %v1945_v3 }
 0x3d5   : > { %3081 = vmatpush3.msra.mxu1 %v2124_v11  ;;  %3082 = vmatprep.mubr.msk.f32.mxu1 %vm3370_vm3, %v3369_v8 }
 0x3d6   : > { %3096 = vmatprep.subr.mxu1 %v2348_v56 }
 0x3d8   : > { %3083 = vmatmul.mubr.msk.f32.vlgmr.msra.gmra.mxu1 %vm817_vm4, %v2120_v10  ;;  %v2909_v10 = vld [vmem:[%s696_s14] ss:$0 sm:$0xff] }
 0x3d9   : > { %3097 = vmatpush3.msra.mxu1 %v2348_v56  ;;  %v2918_v56 = vld [vmem:[%s705_s28] ss:$0 sm:$0xff]  ;;  %s3993_s28 = sld [smem:[#allocation27_spill]] (!%p2919_p8) }
 0x3da   : > { %3098 = vmatprep.subr.mxu1 %v2347_v57 }
 0x3db   : > { %3099 = vmatpush3.msra.mxu1 %v2347_v57 }
 0x3dc   : > { %3100 = vmatprep.subr.mxu1 %v2346_v58 }
 0x3dd   : > { %3101 = vmatpush3.msra.mxu1 %v2346_v58 }
 0x3de   : > { %3102 = vmatprep.subr.mxu1 %v2345_v59 }
 0x3df   : > { %3103 = vmatpush3.msra.mxu1 %v2345_v59 }
 0x44e   : > { %v977_v12 = vpop.f32.mrf.mxu1 }
 0x44f   : > { %981 = vst.msk [vmem:[#allocation4] sm:$0xff] %vm817_vm4, %v977_v12  ;;  %v2910_v12 = vld [vmem:[%s699_s5] ss:$0 sm:$0xff] }
 0x450   : > { %v3014_v13 = vpop.f32.mrf.mxu1 }
 0x452   : > { %v1148_v16 = vpop.f32.mrf.mxu1 }
 0x453   : > { %1153 = vrot.lane.b32.xlu0 %v1148_v16, %s3382_s22 }
 0x454   : > { %v3024_v17 = vpop.f32.mrf.mxu1 }
 0x456   : > { %v1324_v14 = vpop.f32.mrf.mxu1 }
 0x457   : > { %1329 = vrot.lane.b32.xlu1 %v1324_v14, %s3383_s27 }
 0x458   : > { %v3034_v18 = vpop.f32.mrf.mxu1 }
 0x45a   : > { %v1500_v8 = vpop.f32.mrf.mxu1 }
 0x45b   : > { %1505 = vrot.lane.b32.xlu1 %v1500_v8, %s3384_s19 }
 0x45c   : > { %v3044_v19 = vpop.f32.mrf.mxu1 }
 0x45d   : > { %v2442_v19 = vld [vmem:[%s3579_s21 + $0x18] sm:$0xff] }
 0x48b   : > { %v1674_v20 = vpop.f32.mrf.mxu1 }
 0x48c   : > { %1678 = vst.msk [vmem:[#allocation4 + $0x8] sm:$0xff] %vm817_vm4, %v1674_v20  ;;  %v2441_v20 = vld [vmem:[%s3579_s21 + $0x10] sm:$0xff] }
 0x48d   : > { %v3054_v23 = vpop.f32.mrf.mxu1 }
 0x48e   : > { %v2911_v23 = vld [vmem:[%s3992_s1] ss:$0 sm:$0xff] }
 0x490   : > { %v1845_v25 = vpop.f32.mrf.mxu1 }
 0x491   : > { %1850 = vrot.lane.b32.xlu0 %v1845_v25, %s3382_s22 }
 0x492   : > { %v3064_v27 = vpop.f32.mrf.mxu1 }
 0x494   : > { %v2020_v28 = vpop.f32.mrf.mxu1 }
 0x495   : > { %2025 = vrot.lane.b32.xlu0 %v2020_v28, %s3383_s27 }
 0x496   : > { %v3074_v29 = vpop.f32.mrf.mxu1 }
 0x498   : > { %v2195_v30 = vpop.f32.mrf.mxu1 }
 0x499   : > { %2200 = vrot.lane.b32.xlu1 %v2195_v30, %s3384_s19  ;;  %v2914_v30 = vld [vmem:[%s693_s16] ss:$0 sm:$0xff] }
 0x49a   : > { %v3084_v31 = vpop.f32.mrf.mxu1 }
 0x4c5   : > { %v1154_v32 = vpop.permute.xlu0 %1153 }
 0x4c6   : > { %1157 = vst.msk [vmem:[#allocation4] sm:$0xff] %vm1156_vm5, %v1154_v32 }
 0x4c9   : > { %v1330_v33 = vpop.permute.xlu1 %1329 }
 0x4ca   : > { %1333 = vst.msk [vmem:[#allocation4] sm:$0xff] %vm1332_vm6, %v1330_v33 }
 0x4cd   : > { %v1506_v34 = vpop.permute.xlu1 %1505 }
 0x4ce   : > { %1509 = vst.msk [vmem:[#allocation4] sm:$0xff] %vm1508_vm7, %v1506_v34 }
 0x4d5   : > { %v2204_v35 = vld [vmem:[#allocation4] sm:$0xff] }
 0x4d6   : > { %3093 = vmatprep.mubr.msk.f32.mxu0 %vm728_vm1, %v2204_v35 }
 0x503   : > { %v1851_v36 = vpop.permute.xlu0 %1850 }
 0x504   : > { %1853 = vst.msk [vmem:[#allocation4 + $0x8] sm:$0xff] %vm1156_vm5, %v1851_v36 }
 0x507   : > { %v2026_v37 = vpop.permute.xlu0 %2025 }
 0x508   : > { %2028 = vst.msk [vmem:[#allocation4 + $0x8] sm:$0xff] %vm1332_vm6, %v2026_v37 }
 0x50b   : > { %v2201_v38 = vpop.permute.xlu1 %2200 }
 0x50c   : > { %2203 = vst.msk [vmem:[#allocation4 + $0x8] sm:$0xff] %vm1508_vm7, %v2201_v38 }
 0x513   : > { %v2205_v39 = vld [vmem:[#allocation4 + $0x8] sm:$0xff] }
 0x514   : > { %3094 = vmatmul.mubr.msk.f32.vlgmr.msra.gmra.mxu0 %vm728_vm1, %v2205_v39 }
 0x515   : > { %3108 = vmatpush3.msra.mxu0 %v2446_v60 }
 0x516   : > { %3109 = vmatprep.subr.mxu0 %v2445_v61 }
 0x517   : > { %3110 = vmatpush3.msra.mxu0 %v2445_v61 }
 0x518   : > { %3111 = vmatprep.subr.mxu0 %v2444_v62 }
 0x519   : > { %3112 = vmatpush3.msra.mxu0 %v2444_v62 }
 0x51a   : > { %3113 = vmatprep.subr.mxu0 %v2443_v63 }
 0x51b   : > { %3114 = vmatpush3.msra.mxu0 %v2443_v63 }
 0x51c   : > { %3115 = vmatprep.subr.mxu0 %v2442_v19 }
 0x51d   : > { %3116 = vmatpush3.msra.mxu0 %v2442_v19 }
 0x51e   : > { %3117 = vmatprep.subr.mxu0 %v2441_v20 }
 0x51f   : > { %3118 = vmatpush3.msra.mxu0 %v2441_v20 }
 0x520   : > { %3119 = vmatprep.subr.mxu0 %v2440_v21 }
 0x521   : > { %3120 = vmatpush3.msra.mxu0 %v2440_v21 }
 0x522   : > { %3121 = vmatprep.subr.mxu0 %v2439_v22 }
 0x523   : > { %3122 = vmatpush3.msra.mxu0 %v2439_v22 }
 0x5d4   : > { %v3095_v41 = vpop.f32.mrf.mxu0 }
 0x5d5   : > { %v2295_v42 = vadd.f32 %v3095_v41, %v2906_v40 }
 0x5d6   : > { %v2289_v43 = vpop.f32.mrf.mxu0 }
 0x5d7   : > { %v2290_v44 = vadd.f32 %v2906_v40, %v2289_v43  ;;  %v2299_v45 = vadd.f32 %v2295_v42, %v3609_v7 }
 0x5d9   : > { %v2305_v46 = vsel %vm728_vm1, %v2299_v45, 0.0  ;;  %v2298_v47 = vadd.f32 %v2290_v44, %v3605_v4 }
 0x5da   : > { %2306 = vadd.xlane.f32.xlu1 %v2305_v46 }
 0x5db   : > { %v2302_v48 = vsel %vm728_vm1, %v2298_v47, 0.0 }
 0x5dc   : > { %2303 = vadd.xlane.f32.xlu0 %v2302_v48 }
 0x663   : > { %v2307_v49 = vpop.xlane.xlu1 %2306 }
 0x664   : > { %v2310_v50 = vmul.f32 0.03125, %v2307_v49 }
 0x665   : > { %v2304_v51 = vpop.xlane.xlu0 %2303 }
 0x666   : > { %v2309_v52 = vmul.f32 0.03125, %v2304_v51  ;;  %v2312_v15 = vsub.f32 %v2299_v45, %v2310_v50 }
 0x668   : > { %v2311_v53 = vsub.f32 %v2298_v47, %v2309_v52  ;;  %v2314_v55 = vmul.f32 %v2312_v15, %v2312_v15 }
 0x66a   : > { %v2313_v54 = vmul.f32 %v2311_v53, %v2311_v53  ;;  %v2318_v4 = vsel %vm728_vm1, %v2314_v55, 0.0 }
 0x66c   : > { %v2315_v7 = vsel %vm728_vm1, %v2313_v54, 0.0 }
 0x66d   : > { %2316 = vadd.xlane.f32.xlu0 %v2315_v7  ;;  %v2917_v7 = vld [vmem:[%s702_s20] ss:$0 sm:$0xff] }
 0x671   : > { %2319 = vadd.xlane.f32.xlu0 %v2318_v4 }
 0x6f6   : > { %v2317_v0 = vpop.xlane.xlu0 %2316 }
 0x6f7   : > { %v2321_v1 = vmul.f32 0.03125, %v2317_v0 }
 0x6f9   : > { %v2323_v2 = vadd.f32 1e-05, %v2321_v1 }
 0x6fa   : > { %v2320_v3 = vpop.xlane.xlu0 %2319 }
 0x6fb   : > { %3234 = vrsqrt.f32 %v2323_v2  ;;  %v2322_v5 = vmul.f32 0.03125, %v2320_v3 }
 0x6fd   : > { %v2324_v6 = vadd.f32 1e-05, %v2322_v5 }
 0x6ff   : > { %3236 = vrsqrt.f32 %v2324_v6 }
 0x708   : > { %v3235_v9 = vpop.eup %3234 }
 0x709   : > { %v2327_v11 = vmul.f32 %v3235_v9, %v2311_v53 }
 0x70b   : > { %v2335_v13 = vmul.f32 %v2909_v10, %v2327_v11 }
 0x70c   : > { %v3237_v16 = vpop.eup %3236 }
 0x70d   : > { %v2328_v17 = vmul.f32 %v3237_v16, %v2312_v15  ;;  %v2343_v14 = vadd.f32 %v2910_v12, %v2335_v13 }
 0x70f   : > { %v2336_v18 = vmul.f32 %v2909_v10, %v2328_v17  ;;  %3104 = vmatprep.mubr.msk.f32.mxu1 %vm728_vm1, %v2343_v14 }
 0x711   : > { %v2344_v8 = vadd.f32 %v2910_v12, %v2336_v18 }
 0x713   : > { %3105 = vmatmul.mubr.msk.f32.vlgmr.msra.gmra.mxu1 %vm728_vm1, %v2344_v8 }
 0x7d3   : > { %v3106_v24 = vpop.f32.mrf.mxu1 }
 0x7d4   : > { %v2434_v25 = vadd.f32 %v3106_v24, %v2911_v23 }
 0x7d5   : > { %v2428_v26 = vpop.f32.mrf.mxu1 }
 0x7d6   : > { %v2429_v27 = vadd.f32 %v2911_v23, %v2428_v26  ;;  %v2438_v29 = vmax.f32 %v2434_v25, 0.0 }
 0x7d8   : > { %v2437_v28 = vmax.f32 %v2429_v27, 0.0 }
 0x7da   : > { %3123 = vmatprep.mubr.msk.f32.mxu0 %vm2454_vm8, %v2437_v28 }
 0x7db   : > { %3124 = vmatmul.mubr.msk.f32.vlgmr.msra.gmra.mxu0 %vm2454_vm8, %v2438_v29 }
 0x89b   : > { %v3125_v31 = vpop.f32.mrf.mxu0 }
 0x89c   : > { %v2533_v32 = vadd.f32 %v3125_v31, %v2914_v30 }
 0x89d   : > { %v2527_v33 = vpop.f32.mrf.mxu0 }
 0x89e   : > { %v2528_v34 = vadd.f32 %v2914_v30, %v2527_v33  ;;  %v2537_v35 = vadd.f32 %v2533_v32, %v2344_v8 }
 0x8a0   : > { %v2543_v36 = vsel %vm728_vm1, %v2537_v35, 0.0  ;;  %v2536_v37 = vadd.f32 %v2528_v34, %v2343_v14 }
 0x8a1   : > { %2544 = vadd.xlane.f32.xlu0 %v2543_v36 }
 0x8a2   : > { %v2540_v38 = vsel %vm728_vm1, %v2536_v37, 0.0 }
 0x8a3   : > { %2541 = vadd.xlane.f32.xlu1 %v2540_v38 }
 0x92a   : > { %v2545_v39 = vpop.xlane.xlu0 %2544 }
 0x92b   : > { %v2547_v40 = vmul.f32 0.03125, %v2545_v39 }
 0x92c   : > { %v2542_v41 = vpop.xlane.xlu1 %2541 }
 0x92d   : > { %v2549_v42 = vsub.f32 %v2537_v35, %v2547_v40  ;;  %v2546_v43 = vmul.f32 0.03125, %v2542_v41 }
 0x92f   : > { %v2548_v44 = vsub.f32 %v2536_v37, %v2546_v43  ;;  %v2551_v45 = vmul.f32 %v2549_v42, %v2549_v42 }
 0x931   : > { %v2555_v46 = vsel %vm728_vm1, %v2551_v45, 0.0  ;;  %v2550_v47 = vmul.f32 %v2548_v44, %v2548_v44 }
 0x932   : > { %2556 = vadd.xlane.f32.xlu0 %v2555_v46 }
 0x933   : > { %v2552_v48 = vsel %vm728_vm1, %v2550_v47, 0.0 }
 0x934   : > { %2553 = vadd.xlane.f32.xlu1 %v2552_v48 }
 0x9bb   : > { %v2557_v49 = vpop.xlane.xlu0 %2556 }
 0x9bc   : > { %v2559_v50 = vmul.f32 0.03125, %v2557_v49 }
 0x9bd   : > { %v2554_v51 = vpop.xlane.xlu1 %2553 }
 0x9be   : > { %v2561_v52 = vadd.f32 1e-05, %v2559_v50  ;;  %v2558_v15 = vmul.f32 0.03125, %v2554_v51 }
 0x9c0   : > { %3238 = vrsqrt.f32 %v2561_v52  ;;  %v2560_v53 = vadd.f32 1e-05, %v2558_v15 }
 0x9c2   : > { %3240 = vrsqrt.f32 %v2560_v53 }
 0x9cd   : > { %v3239_v54 = vpop.eup %3238 }
 0x9ce   : > { %v2565_v55 = vmul.f32 %v3239_v54, %v2549_v42 }
 0x9cf   : > { %v3241_v4 = vpop.eup %3240 }
 0x9d0   : > { %v2573_v57 = vmul.f32 %v2917_v7, %v2565_v55  ;;  %v2564_v58 = vmul.f32 %v3241_v4, %v2548_v44 }
 0x9d2   : > { %v2581_v59 = vadd.f32 %v2918_v56, %v2573_v57  ;;  %v2572_v60 = vmul.f32 %v2917_v7, %v2564_v58  ;;  %2587 = sbr.rel (%p2919_p8) target bundleno = 2832 (0xb10), region = 92 }
 0x9d4   : > { %2583 = vst.msk [vmem:[#allocation2 + $0x8] sm:$0xff] %vm728_vm1, %v2581_v59  ;;  %v2580_v61 = vadd.f32 %v2918_v56, %v2572_v60 }
 0x9d6   : > { %2582 = vst.msk [vmem:[#allocation2] sm:$0xff] %vm728_vm1, %v2580_v61 }
 0x9d7   : > { %v2590_v62 = vsel %vm728_vm1, %v2580_v61, 0.0  ;;  %v2593_v63 = vsel %vm728_vm1, %v2581_v59, 0.0  ;;  %v2920_v20 = vld [vmem:[%s3993_s28] ss:$0 sm:$0xff] }
 0x9d8   : > { %2591 = vadd.xlane.f32.xlu0 %v2590_v62  ;;  %v2921_v22 = vld [vmem:[%s3994_s0] ss:$0 sm:$0xff] }
 0x9dc   : > { %2594 = vadd.xlane.f32.xlu0 %v2593_v63 }
 0xa61   : > { %v2592_v0 = vpop.xlane.xlu0 %2591 }
 0xa62   : > { %v2596_v1 = vmul.f32 0.03125, %v2592_v0 }
 0xa64   : > { %v2598_v2 = vsub.f32 %v2580_v61, %v2596_v1 }
 0xa65   : > { %v2595_v3 = vpop.xlane.xlu0 %2594 }
 0xa66   : > { %v2597_v5 = vmul.f32 0.03125, %v2595_v3  ;;  %v2600_v6 = vmul.f32 %v2598_v2, %v2598_v2 }
 0xa68   : > { %v2599_v9 = vsub.f32 %v2581_v59, %v2597_v5  ;;  %v2602_v10 = vsel %vm728_vm1, %v2600_v6, 0.0 }
 0xa69   : > { %2603 = vadd.xlane.f32.xlu1 %v2602_v10 }
 0xa6a   : > { %v2601_v11 = vmul.f32 %v2599_v9, %v2599_v9 }
 0xa6c   : > { %v2605_v12 = vsel %vm728_vm1, %v2601_v11, 0.0 }
 0xa6d   : > { %2606 = vadd.xlane.f32.xlu1 %v2605_v12 }
 0xaf2   : > { %v2604_v13 = vpop.xlane.xlu1 %2603 }
 0xaf3   : > { %v2608_v16 = vmul.f32 0.03125, %v2604_v13 }
 0xaf5   : > { %v2610_v17 = vadd.f32 1e-05, %v2608_v16 }
 0xaf6   : > { %v2607_v14 = vpop.xlane.xlu1 %2606 }
 0xaf7   : > { %3242 = vrsqrt.f32 %v2610_v17  ;;  %v2609_v18 = vmul.f32 0.03125, %v2607_v14 }
 0xaf9   : > { %v2611_v8 = vadd.f32 1e-05, %v2609_v18 }
 0xafb   : > { %3244 = vrsqrt.f32 %v2611_v8 }
 0xb04   : > { %v3243_v19 = vpop.eup %3242 }
 0xb05   : > { %v2614_v21 = vmul.f32 %v3243_v19, %v2598_v2 }
 0xb07   : > { %v2622_v23 = vmul.f32 %v2920_v20, %v2614_v21 }
 0xb08   : > { %v3245_v24 = vpop.eup %3244 }
 0xb09   : > { %v2630_v25 = vadd.f32 %v2921_v22, %v2622_v23  ;;  %v2615_v26 = vmul.f32 %v3245_v24, %v2599_v9 }
 0xb0b   : > { %2632 = vst.msk [vmem:[#allocation8] sm:$0xff] %vm728_vm1, %v2630_v25  ;;  %v2623_v27 = vmul.f32 %v2920_v20, %v2615_v26 }
 0xb0d   : > { %v2631_v28 = vadd.f32 %v2921_v22, %v2623_v27 }
 0xb0f   : > { %2633 = vst.msk [vmem:[#allocation8 + $0x8] sm:$0xff] %vm728_vm1, %v2631_v28 }
 0xb10 PF: > { %s3385_s13 = smov [#allocation8]   ;;  %s2933_s23 = sshll.u32 %s3494_s25, 10 }
 0xb11   : > { %s2645_s15 = sshll.u32 %s3385_s13, 4  ;;  %p3995_p10 = scmp.eq.s32.totalorder %s3494_s25, 1  ;;  %s2646_s15 = int_to_ptr.vmem [resolvable:$true] %s2645_s15 }
 0xb12   : > { %s3272_s30 = scalar_lea.vmem %s2646_s15, 256  ;;  %p3279_p13 = scmp.lt.s32.totalorder %s2646_s15, %s2646_s15 }
 0xb13   : > { %p3273_p9 = scmp.ne.s32.totalorder %s2646_s15, %s3272_s30  ;;  %p3280_p0 = scmp.lt.s32.totalorder %s3272_s30, %s3272_s30 }
 0xb15   : > { %p3274_p11 = pnand %p3273_p9, %p3995_p10  ;;  %p3281_p1 = por %p3280_p0, %p3279_p13 }
 0xb17   : > { %p3275_p12 = pneg %p3274_p11 }
 0xb19   : > { %p3282_p3 = pnand %p3281_p1, %p3275_p12 }
 0xb1b   : > { %3285 = shalt.err (!%p3282_p3)
}
 0xb1c   : > { %s3386_s5 = smov 128   ;;  %p3996_p4 = pmov %p3995_p10 }
 0xb1d   : > { %s3997_s1 = sld [smem:[#allocation29_spill]]  ;;  %s2661_s17 = sshll.u32 %s3601_s29, 4  ;;  %s3886_s17 = int_to_ptr.vmem [resolvable:$true] %s2661_s17 }
 0xb1e   : > { %s3998_s3 = sld [smem:[#allocation15_spill]]  ;;  %s3296_s24 = scalar_lea.vmem %s3886_s17, 1024 }
 0xb1f   : > { %s4000_s27 = sld [smem:[#allocation30_spill]]  ;;  %p3297_p7 = scmp.ne.s32.totalorder %s3886_s17, %s3296_s24 }
 0xb20   : > { %s3387_s26 = smov [#allocation9]  }
 0xb21   : > { %p3298_p2 = pnand %p3297_p7, %p3513_p5  ;;  %s3300_s0 = sshll.u32 %s3387_s26, 4  ;;  %s3301_s0 = int_to_ptr.vmem [resolvable:$false] %s3300_s0 }
 0xb22   : > { %s3302_s13 = scalar_lea.vmem %s3301_s0, 2048  ;;  %p3303_p8 = scmp.lt.s32.totalorder %s3886_s17, %s3301_s0 }
 0xb23   : > { %3131 = dma.vmem_to_hbm [thread:$0]  (%p3996_p4), %s2646_s15, 256, %s3997_s1, [#allocation7], %s3386_s5, %s3386_s5, %s3382_s22  }
 0xb24   : > { %s4001_s20 = sand.u32 1, %s3998_s3   ;;  %p3299_p6 = pneg %p3298_p2 }
 0xb25   : > { %s3883_s19 = scalar_lea.hbm %s4000_s27, %s2933_s23  ;;  %s2635_s28 = scalar_lea.sflag [#allocation10], %s4001_s20 }
 0xb26   : > { %p3304_p9 = scmp.lt.s32.totalorder %s3302_s13, %s3296_s24 }
 0xb28   : > { %p3305_p10 = por %p3304_p9, %p3303_p8 }
 0xb2a   : > { %p3306_p11 = pnand %p3305_p10, %p3299_p6 }
 0xb2c   : > { %3309 = shalt.err (!%p3306_p11)
}
 0xb2d   : > { %s3310_s29 = scalar_lea.hbm %s3883_s19, 1024  ;;  %s3314_s30 = scalar_lea.hbm %s4000_s27, 2048 }
 0xb2e   : > { %p3311_p12 = scmp.ne.s32.totalorder %s3883_s19, %s3310_s29  ;;  %p3315_p1 = scmp.lt.s32.totalorder %s3883_s19, %s4000_s27 }
 0xb2f   : > { %p3316_p3 = scmp.lt.s32.totalorder %s3314_s30, %s3310_s29 }
 0xb30   : > { %p3312_p13 = pnand %p3311_p12, %p3513_p5 }
 0xb31   : > { %p3317_p4 = por %p3316_p3, %p3315_p1 }
 0xb32   : > { %p3313_p0 = pneg %p3312_p13 }
 0xb34   : > { %p3318_p7 = pnand %p3317_p4, %p3313_p0 }
 0xb36   : > { %3321 = shalt.err (!%p3318_p7)
}
 0xb37   : > { %3132 = dma.vmem_to_hbm [thread:$0]  (%p3513_p5), %s3886_s17, 1024, %s3883_s19, %s2635_s28, %s3386_s5, %s3386_s5, %s3382_s22  }
 0xb38   : > { %p4002_p2 = scmp.eq.s32.totalorder %s3494_s25, 1 }
 0xb3a   : > { %3343 = dma.done.wait (%p4002_p2), [#allocation7], 256   ;;  %p4003_p6 = pmov %p4002_p2 }
 0xb3c   : > { %3345 = vsyncadd (%p4003_p6), [#allocation7], 4294967040 }
 0xb3d PF: > { %s4004_s1 = sld [smem:[#allocation17_spill]] }
 0xb3e   : > { %s4005_s3 = sld [smem:[#allocation14_spill]] }
 0xb3f   : > { %s4006_s21 = sld [smem:[#allocation21_spill]] }
 0xb43   : > { %p3148_p8 = scmp.ge.s32.totalorder %s4004_s1, 2 }
 0xb44   : > { %s2680_s16 = sand.u32 1, %s4005_s3  }
 0xb45   : > { %p4007_p9 = scmp.ne.s32.totalorder %s4006_s21, 0  ;;  %s2681_s6 = scalar_lea.sflag [#allocation10], %s2680_s16 }
 0xb47   : > { %p3141_p10 = pnand %p3148_p8, %p4007_p9 }
 0xb49   : > { %p3142_p11 = pneg %p3141_p10 }
 0xb4b   : > { %3347 = dma.done.wait (%p3142_p11), %s2681_s6, 1024  }
 0xb4c   : > { %3349 = vsyncadd (%p3142_p11), %s2681_s6, 4294966272  ;;  %s4008_s24 = sld [smem:[#allocation18_spill]] }
 0xb4d   : > { %s4009_s21 = sld [smem:[#allocation15_spill]] }
 0xb4e   : > { %s4010_s22 = sld [smem:[#allocation16_spill]] }
 0xb4f   : > { %s4011_s23 = sld [smem:[#allocation19_spill]] }
 0xb52   : > { %p29_p5 = scmp.ge.s32.totalorder %s4008_s24, 4  }
 0xb54   :  { %31 = sbr.rel (!%p29_p5) target bundleno = 15 (0xf), region = 177 }
 0xb59   :  { %2686 = vsyncpa [#allocation6], 1 }
 0xb5a   :  { %2688 = vsyncpa [#allocation6 + $0x1], 1 }
 0xb5b   :  { %2689 = vsyncpa [#allocation7], 1 }
 0xb5c   :  { %2691 = vsyncpa [#allocation7 + $0x1], 1 }
 0xb5d   :  { %2692 = vsyncpa [#allocation10], 1 }
 0xb5e   :  { %2694 = vsyncpa [#allocation10 + $0x1], 1 }

</bundles_post_ra>
